<compile_context>
chip_gen: v5e
topology: v5e:2x2
jax: 0.10.0
libtpu: 0.0.40
codegen_flags: <defaults>
</compile_context>

<pallas_src>
import jax
import jax.numpy as jnp
from jax import lax
from jax.experimental import pallas as pl
from jax.experimental.pallas import tpu as pltpu


def _row_block(h):
    """Row-block size for the in-kernel loops (8-16 sublanes per iteration)."""
    for t in (8, 16, 32):
        if h % t == 0:
            return t
    return h


# --------------------------------------------------------------------------
# Pallas kernel: one batch element per grid step
# --------------------------------------------------------------------------
def _make_kernel(H, W, C, TH):
    WC = W * C
    NB = H // TH
    inv_w = 1.0 / W
    inv_h = 1.0 / H

    def kernel(x_ref, w1_ref, b1_ref, wh_ref, bh_ref, ww_ref, bw_ref,
               o_ref, pool_sc, xwf_sc, att_sc):
        # x_ref / o_ref blocks: (1, H, W*C), lane-dense flat layout.

        # -------- pass 1: fused coordinate pooling (one sweep over x) ------
        xwf_sc[...] = jnp.zeros_like(xwf_sc)

        def pool_body(i, carry):
            h0 = pl.multiple_of(i * TH, TH)
            tile = x_ref[0, pl.ds(h0, TH), :].astype(jnp.float32)   # (TH, WC)
            # W-pool partial: running column sum over H (lane-dense, f32).
            xwf_sc[...] += jnp.sum(tile, axis=0, keepdims=True)
            # H-pool: per-row sum over the W stride-C lane strips (f32 accum).
            row_sum = tile[:, 0:C]
            for w in range(1, W):
                row_sum = row_sum + tile[:, w * C:(w + 1) * C]
            pool_sc[pl.ds(h0, TH), :] = row_sum * inv_w             # x_h rows
            return carry

        lax.fori_loop(0, NB, pool_body, 0, unroll=True)

        # Unflatten the (1, W*C) H-sum into rows H..H+W-1 of the pooled stack
        # (static strip copies; shapes are tiny).
        for w in range(W):
            pool_sc[H + w:H + w + 1, :] = xwf_sc[:, w * C:(w + 1) * C] * inv_h

        # -------- shared 1x1 conv (BN folded) + h_swish: one matmul --------
        y = jnp.dot(pool_sc[...], w1_ref[...],
                    preferred_element_type=jnp.float32) + b1_ref[...]
        y = y * jnp.clip(y + 3.0, 0.0, 6.0) * (1.0 / 6.0)           # h_swish

        # Per-axis attention gates.
        a_h = jax.nn.sigmoid(
            jnp.dot(y[:H], wh_ref[...], preferred_element_type=jnp.float32)
            + bh_ref[...])                                          # (H, C)
        a_w = jax.nn.sigmoid(
            jnp.dot(y[H:], ww_ref[...], preferred_element_type=jnp.float32)
            + bw_ref[...])                                          # (W, C)
        # The x_h rows of pool_sc are dead now; reuse them to stage a_h so the
        # apply loop can read it with a dynamic row offset (pl.ds on a ref).
        pool_sc[0:H, :] = a_h

        # -------- pass 2: residual-fused gating, row-blocked, lane-dense ---
        #   out = x * a_w * a_h + x  ==  x * (1 + a_h[h,c] * a_w[w,c])
        def apply_body(i, carry):
            h0 = pl.multiple_of(i * TH, TH)
            ah_blk = pool_sc[pl.ds(h0, TH), :]                      # (TH, C)
            # Stage the flat (TH, W*C) gate via static lane strips, then do
            # ONE dense multiply and ONE dense (lane-aligned) store to HBM.
            for w in range(W):
                att_sc[:, w * C:(w + 1) * C] = 1.0 + ah_blk * a_w[w:w + 1, :]
            x_tile = x_ref[0, pl.ds(h0, TH), :]                     # input dtype
            o_ref[0, pl.ds(h0, TH), :] = (
                x_tile * att_sc[...].astype(x_tile.dtype)).astype(o_ref.dtype)
            return carry

        lax.fori_loop(0, NB, apply_body, 0, unroll=True)

    return kernel


def res_coordatt_pallas(x_nhwc, w1, b1, wh, bh, ww, bw):
    """Res_CoordAtt forward (eval-mode BN folded into conv1, oup == inp).

    x_nhwc: (N, H, W, C); w1: (C, mip); b1: (1, mip); wh/ww: (mip, C);
    bh/bw: (1, C).
    """
    N, H, W, C = x_nhwc.shape
    mip = w1.shape[1]
    assert w1.shape == (C, mip) and wh.shape == (mip, C) and ww.shape == (mip, C)

    WC = W * C
    TH = _row_block(H)
    x_flat = x_nhwc.reshape(N, H, WC)     # free: NHWC is contiguous in (W, C)

    # VMEM budget: double-buffered in + out blocks, scratch, loop temporaries.
    blk = H * WC * x_flat.dtype.itemsize
    vmem_limit = int(min(100 * 2 ** 20,
                         max(8 * 2 ** 20, 4 * blk + 16 * TH * WC * 4 + 2 ** 21)))

    out_flat = pl.pallas_call(
        _make_kernel(H, W, C, TH),
        out_shape=jax.ShapeDtypeStruct((N, H, WC), x_nhwc.dtype),
        grid_spec=pltpu.PrefetchScalarGridSpec(
            num_scalar_prefetch=0,
            grid=(N,),
            in_specs=[
                pl.BlockSpec((1, H, WC), lambda n: (n, 0, 0)),
                pl.BlockSpec((C, mip), lambda n: (0, 0)),
                pl.BlockSpec((1, mip), lambda n: (0, 0)),
                pl.BlockSpec((mip, C), lambda n: (0, 0)),
                pl.BlockSpec((1, C), lambda n: (0, 0)),
                pl.BlockSpec((mip, C), lambda n: (0, 0)),
                pl.BlockSpec((1, C), lambda n: (0, 0)),
            ],
            out_specs=pl.BlockSpec((1, H, WC), lambda n: (n, 0, 0)),
            scratch_shapes=[
                pltpu.VMEM((H + W, C), jnp.float32),   # pooled stack / a_h stage
                pltpu.VMEM((1, WC), jnp.float32),      # flat H-sum accumulator
                pltpu.VMEM((TH, WC), jnp.float32),     # per-tile gate stage
            ],
        ),
        compiler_params=pltpu.CompilerParams(
            dimension_semantics=("parallel",),
            vmem_limit_bytes=vmem_limit),
    )(x_flat, w1, b1, wh, bh, ww, bw)
    return out_flat.reshape(N, H, W, C)


# --------------------------------------------------------------------------
# Parameter construction (deterministic) + BN folding
# --------------------------------------------------------------------------
def fuse_conv_bn(w, b, gamma, beta, mean, var, eps=1e-5):
    """w: (Cin, Cout), b: (Cout,). Eval-mode BN folded into the 1x1 conv."""
    scale = gamma / jnp.sqrt(var + eps)
    return w * scale[None, :], ((b - mean) * scale + beta)[None, :]


def make_params(key, c, reduction=8):
    mip = max(8, c // reduction)
    ks = jax.random.split(key, 10)
    w1 = jax.random.normal(ks[0], (c, mip), jnp.float32) * 0.2
    b1 = jax.random.normal(ks[1], (mip,), jnp.float32) * 0.05
    g1 = 0.5 + jax.random.uniform(ks[2], (mip,), jnp.float32)
    bt1 = jax.random.normal(ks[3], (mip,), jnp.float32) * 0.05
    m1 = jax.random.normal(ks[4], (mip,), jnp.float32) * 0.05
    v1 = 0.5 + jax.random.uniform(ks[5], (mip,), jnp.float32)
    wh = jax.random.normal(ks[6], (mip, c), jnp.float32) * 0.2
    bh = jax.random.normal(ks[7], (c,), jnp.float32) * 0.05
    ww = jax.random.normal(ks[8], (mip, c), jnp.float32) * 0.2
    bw = jax.random.normal(ks[9], (c,), jnp.float32) * 0.05

    w1f, b1f = fuse_conv_bn(w1, b1, g1, bt1, m1, v1)
    fused = (w1f, b1f, wh, bh[None, :], ww, bw[None, :])
    raw = (w1, b1, g1, bt1, m1, v1, wh, bh, ww, bw)
    return fused, raw


# --------------------------------------------------------------------------
# Pure-JAX reference: UNFUSED, mirrors the PyTorch module step by step
# (cat -> conv1 -> BN(eval) -> h_swish -> split -> gates -> x*a_w*a_h + x)
# --------------------------------------------------------------------------
def res_coordatt_ref(x_nhwc, raw, eps=1e-5):
    w1, b1, g1, bt1, m1, v1, wh, bh, ww, bw = raw
    _, H, _, _ = x_nhwc.shape
    x_h = jnp.mean(x_nhwc, axis=2)                      # (N, H, C)  pool over W
    x_w = jnp.mean(x_nhwc, axis=1)                      # (N, W, C)  pool over H
    y = jnp.concatenate([x_h, x_w], axis=1)             # (N, H+W, C)
    y = jnp.einsum("nsc,cm->nsm", y, w1) + b1           # conv1 (1x1)
    y = (y - m1) / jnp.sqrt(v1 + eps) * g1 + bt1        # bn1 (eval mode)
    y = y * jnp.clip(y + 3.0, 0.0, 6.0) / 6.0           # h_swish
    y_h, y_w = y[:, :H], y[:, H:]
    a_h = jax.nn.sigmoid(jnp.einsum("nhm,mc->nhc", y_h, wh) + bh)   # (N, H, C)
    a_w = jax.nn.sigmoid(jnp.einsum("nwm,mc->nwc", y_w, ww) + bw)   # (N, W, C)
    out = x_nhwc * a_w[:, None, :, :] * a_h[:, :, None, :]          # CoordAtt
    return out + x_nhwc                                             # residual


if __name__ == "__main__":
    key = jax.random.PRNGKey(0)
    k_x, k_p = jax.random.split(key)

    # Res_CoordAtt(inp=4, oup=4, reduction=8) -> mip = max(8, 4 // 8) = 8
    N, C, H, W = 2, 4, 16, 16

    # PyTorch-style NCHW input, transposed to NHWC at the boundary.
    x_nchw = jax.random.normal(k_x, (N, C, H, W), jnp.float32)
    x_nhwc = jnp.transpose(x_nchw, (0, 2, 3, 1))

    fused, raw = make_params(k_p, C, reduction=8)

    out = res_coordatt_pallas(x_nhwc, *fused)
    out = jax.block_until_ready(out)

    ref = res_coordatt_ref(x_nhwc, raw)
    assert out.shape == (N, H, W, C)
    assert jnp.allclose(out, ref, atol=1e-4, rtol=1e-4), \
        "mismatch vs unfused PyTorch-style reference"

    print("KERNEL_OK")
</pallas_src>

<mosaic_0001>
module attributes {stable_mosaic.version = 11 : i64} {
  func.func @kernel(%arg0: i32, %arg1: memref<1x16x64xf32, #tpu.memory_space<vmem>>, %arg2: memref<4x8xf32, #tpu.memory_space<vmem>>, %arg3: memref<1x8xf32, #tpu.memory_space<vmem>>, %arg4: memref<8x4xf32, #tpu.memory_space<vmem>>, %arg5: memref<1x4xf32, #tpu.memory_space<vmem>>, %arg6: memref<8x4xf32, #tpu.memory_space<vmem>>, %arg7: memref<1x4xf32, #tpu.memory_space<vmem>>, %arg8: memref<1x16x64xf32, #tpu.memory_space<vmem>>, %arg9: memref<32x4xf32, #tpu.memory_space<vmem>>, %arg10: memref<1x64xf32, #tpu.memory_space<vmem>>, %arg11: memref<8x64xf32, #tpu.memory_space<vmem>>) attributes {dimension_semantics = [#tpu.dimension_semantics<parallel>], iteration_bounds = array<i64: 2>, scalar_prefetch = 0 : i64, scratch_operands = 3 : i64, tpu.core_type = #tpu.core_type<tc>, window_params = [{transform_indices = @transform_0, window_bounds = array<i64: 1, 16, 64>}, {pipeline_mode = #tpu.pipeline_mode<synchronous>, transform_indices = @transform_1, window_bounds = array<i64: 4, 8>}, {pipeline_mode = #tpu.pipeline_mode<synchronous>, transform_indices = @transform_2, window_bounds = array<i64: 1, 8>}, {pipeline_mode = #tpu.pipeline_mode<synchronous>, transform_indices = @transform_3, window_bounds = array<i64: 8, 4>}, {pipeline_mode = #tpu.pipeline_mode<synchronous>, transform_indices = @transform_4, window_bounds = array<i64: 1, 4>}, {pipeline_mode = #tpu.pipeline_mode<synchronous>, transform_indices = @transform_5, window_bounds = array<i64: 8, 4>}, {pipeline_mode = #tpu.pipeline_mode<synchronous>, transform_indices = @transform_6, window_bounds = array<i64: 1, 4>}, {transform_indices = @transform_7, window_bounds = array<i64: 1, 16, 64>}]} {
    %cst = arith.constant 0.000000e+00 : f32
    %0 = vector.broadcast %cst : f32 to vector<1x64xf32>
    %c0 = arith.constant 0 : index
    %c0_0 = arith.constant 0 : index
    %1 = vector.load %arg10[%c0, %c0_0] : memref<1x64xf32, #tpu.memory_space<vmem>>, vector<1x64xf32>
    tpu.vector_store %arg10[%c0, %c0_0], %0 {strides = array<i32>} : memref<1x64xf32, #tpu.memory_space<vmem>>, vector<1x64xf32>,
    %c0_i32 = arith.constant 0 : i32
    %c8_i32 = arith.constant 8 : i32
    %2 = arith.muli %c0_i32, %c8_i32 : i32
    %3 = tpu.assume_multiple %2, 8 : i32
    %c0_1 = arith.constant 0 : index
    %4 = arith.index_cast %3 : i32 to index
    %c0_2 = arith.constant 0 : index
    %5 = vector.load %arg1[%c0_1, %4, %c0_2] : memref<1x16x64xf32, #tpu.memory_space<vmem>>, vector<1x8x64xf32>
    %6 = vector.shape_cast %5 : vector<1x8x64xf32> to vector<8x64xf32>
    %c0_3 = arith.constant 0 : index
    %c0_4 = arith.constant 0 : index
    %7 = vector.load %arg10[%c0_3, %c0_4] : memref<1x64xf32, #tpu.memory_space<vmem>>, vector<1x64xf32>
    %cst_5 = arith.constant dense<0.000000e+00> : vector<64xf32>
    %8 = vector.multi_reduction <add>, %6, %cst_5 [0] : vector<8x64xf32> to vector<64xf32>
    %9 = vector.shape_cast %8 : vector<64xf32> to vector<1x64xf32>
    %10 = arith.addf %7, %9 : vector<1x64xf32>
    %c0_6 = arith.constant 0 : index
    %c0_7 = arith.constant 0 : index
    %11 = vector.load %arg10[%c0_6, %c0_7] : memref<1x64xf32, #tpu.memory_space<vmem>>, vector<1x64xf32>
    tpu.vector_store %arg10[%c0_6, %c0_7], %10 {strides = array<i32>} : memref<1x64xf32, #tpu.memory_space<vmem>>, vector<1x64xf32>,
    %12 = vector.extract_strided_slice %6 {offsets = [0, 0], sizes = [8, 4], strides = [1, 1]} : vector<8x64xf32> to vector<8x4xf32>
    %13 = vector.extract_strided_slice %6 {offsets = [0, 4], sizes = [8, 4], strides = [1, 1]} : vector<8x64xf32> to vector<8x4xf32>
    %14 = arith.addf %12, %13 : vector<8x4xf32>
    %15 = vector.extract_strided_slice %6 {offsets = [0, 8], sizes = [8, 4], strides = [1, 1]} : vector<8x64xf32> to vector<8x4xf32>
    %16 = arith.addf %14, %15 : vector<8x4xf32>
    %17 = vector.extract_strided_slice %6 {offsets = [0, 12], sizes = [8, 4], strides = [1, 1]} : vector<8x64xf32> to vector<8x4xf32>
    %18 = arith.addf %16, %17 : vector<8x4xf32>
    %19 = vector.extract_strided_slice %6 {offsets = [0, 16], sizes = [8, 4], strides = [1, 1]} : vector<8x64xf32> to vector<8x4xf32>
    %20 = arith.addf %18, %19 : vector<8x4xf32>
    %21 = vector.extract_strided_slice %6 {offsets = [0, 20], sizes = [8, 4], strides = [1, 1]} : vector<8x64xf32> to vector<8x4xf32>
    %22 = arith.addf %20, %21 : vector<8x4xf32>
    %23 = vector.extract_strided_slice %6 {offsets = [0, 24], sizes = [8, 4], strides = [1, 1]} : vector<8x64xf32> to vector<8x4xf32>
    %24 = arith.addf %22, %23 : vector<8x4xf32>
    %25 = vector.extract_strided_slice %6 {offsets = [0, 28], sizes = [8, 4], strides = [1, 1]} : vector<8x64xf32> to vector<8x4xf32>
    %26 = arith.addf %24, %25 : vector<8x4xf32>
    %27 = vector.extract_strided_slice %6 {offsets = [0, 32], sizes = [8, 4], strides = [1, 1]} : vector<8x64xf32> to vector<8x4xf32>
    %28 = arith.addf %26, %27 : vector<8x4xf32>
    %29 = vector.extract_strided_slice %6 {offsets = [0, 36], sizes = [8, 4], strides = [1, 1]} : vector<8x64xf32> to vector<8x4xf32>
    %30 = arith.addf %28, %29 : vector<8x4xf32>
    %31 = vector.extract_strided_slice %6 {offsets = [0, 40], sizes = [8, 4], strides = [1, 1]} : vector<8x64xf32> to vector<8x4xf32>
    %32 = arith.addf %30, %31 : vector<8x4xf32>
    %33 = vector.extract_strided_slice %6 {offsets = [0, 44], sizes = [8, 4], strides = [1, 1]} : vector<8x64xf32> to vector<8x4xf32>
    %34 = arith.addf %32, %33 : vector<8x4xf32>
    %35 = vector.extract_strided_slice %6 {offsets = [0, 48], sizes = [8, 4], strides = [1, 1]} : vector<8x64xf32> to vector<8x4xf32>
    %36 = arith.addf %34, %35 : vector<8x4xf32>
    %37 = vector.extract_strided_slice %6 {offsets = [0, 52], sizes = [8, 4], strides = [1, 1]} : vector<8x64xf32> to vector<8x4xf32>
    %38 = arith.addf %36, %37 : vector<8x4xf32>
    %39 = vector.extract_strided_slice %6 {offsets = [0, 56], sizes = [8, 4], strides = [1, 1]} : vector<8x64xf32> to vector<8x4xf32>
    %40 = arith.addf %38, %39 : vector<8x4xf32>
    %41 = vector.extract_strided_slice %6 {offsets = [0, 60], sizes = [8, 4], strides = [1, 1]} : vector<8x64xf32> to vector<8x4xf32>
    %42 = arith.addf %40, %41 : vector<8x4xf32>
    %cst_8 = arith.constant 6.250000e-02 : f32
    %43 = vector.broadcast %cst_8 : f32 to vector<8x4xf32>
    %44 = arith.mulf %42, %43 : vector<8x4xf32>
    %45 = arith.index_cast %3 : i32 to index
    %c0_9 = arith.constant 0 : index
    %46 = vector.load %arg9[%45, %c0_9] : memref<32x4xf32, #tpu.memory_space<vmem>>, vector<8x4xf32>
    tpu.vector_store %arg9[%45, %c0_9], %44 {strides = array<i32>} : memref<32x4xf32, #tpu.memory_space<vmem>>, vector<8x4xf32>,
    %c1_i32 = arith.constant 1 : i32
    %c8_i32_10 = arith.constant 8 : i32
    %47 = arith.muli %c1_i32, %c8_i32_10 : i32
    %48 = tpu.assume_multiple %47, 8 : i32
    %c0_11 = arith.constant 0 : index
    %49 = arith.index_cast %48 : i32 to index
    %c0_12 = arith.constant 0 : index
    %50 = vector.load %arg1[%c0_11, %49, %c0_12] : memref<1x16x64xf32, #tpu.memory_space<vmem>>, vector<1x8x64xf32>
    %51 = vector.shape_cast %50 : vector<1x8x64xf32> to vector<8x64xf32>
    %c0_13 = arith.constant 0 : index
    %c0_14 = arith.constant 0 : index
    %52 = vector.load %arg10[%c0_13, %c0_14] : memref<1x64xf32, #tpu.memory_space<vmem>>, vector<1x64xf32>
    %cst_15 = arith.constant dense<0.000000e+00> : vector<64xf32>
    %53 = vector.multi_reduction <add>, %51, %cst_15 [0] : vector<8x64xf32> to vector<64xf32>
    %54 = vector.shape_cast %53 : vector<64xf32> to vector<1x64xf32>
    %55 = arith.addf %52, %54 : vector<1x64xf32>
    %c0_16 = arith.constant 0 : index
    %c0_17 = arith.constant 0 : index
    %56 = vector.load %arg10[%c0_16, %c0_17] : memref<1x64xf32, #tpu.memory_space<vmem>>, vector<1x64xf32>
    tpu.vector_store %arg10[%c0_16, %c0_17], %55 {strides = array<i32>} : memref<1x64xf32, #tpu.memory_space<vmem>>, vector<1x64xf32>,
    %57 = vector.extract_strided_slice %51 {offsets = [0, 0], sizes = [8, 4], strides = [1, 1]} : vector<8x64xf32> to vector<8x4xf32>
    %58 = vector.extract_strided_slice %51 {offsets = [0, 4], sizes = [8, 4], strides = [1, 1]} : vector<8x64xf32> to vector<8x4xf32>
    %59 = arith.addf %57, %58 : vector<8x4xf32>
    %60 = vector.extract_strided_slice %51 {offsets = [0, 8], sizes = [8, 4], strides = [1, 1]} : vector<8x64xf32> to vector<8x4xf32>
    %61 = arith.addf %59, %60 : vector<8x4xf32>
    %62 = vector.extract_strided_slice %51 {offsets = [0, 12], sizes = [8, 4], strides = [1, 1]} : vector<8x64xf32> to vector<8x4xf32>
    %63 = arith.addf %61, %62 : vector<8x4xf32>
    %64 = vector.extract_strided_slice %51 {offsets = [0, 16], sizes = [8, 4], strides = [1, 1]} : vector<8x64xf32> to vector<8x4xf32>
    %65 = arith.addf %63, %64 : vector<8x4xf32>
    %66 = vector.extract_strided_slice %51 {offsets = [0, 20], sizes = [8, 4], strides = [1, 1]} : vector<8x64xf32> to vector<8x4xf32>
    %67 = arith.addf %65, %66 : vector<8x4xf32>
    %68 = vector.extract_strided_slice %51 {offsets = [0, 24], sizes = [8, 4], strides = [1, 1]} : vector<8x64xf32> to vector<8x4xf32>
    %69 = arith.addf %67, %68 : vector<8x4xf32>
    %70 = vector.extract_strided_slice %51 {offsets = [0, 28], sizes = [8, 4], strides = [1, 1]} : vector<8x64xf32> to vector<8x4xf32>
    %71 = arith.addf %69, %70 : vector<8x4xf32>
    %72 = vector.extract_strided_slice %51 {offsets = [0, 32], sizes = [8, 4], strides = [1, 1]} : vector<8x64xf32> to vector<8x4xf32>
    %73 = arith.addf %71, %72 : vector<8x4xf32>
    %74 = vector.extract_strided_slice %51 {offsets = [0, 36], sizes = [8, 4], strides = [1, 1]} : vector<8x64xf32> to vector<8x4xf32>
    %75 = arith.addf %73, %74 : vector<8x4xf32>
    %76 = vector.extract_strided_slice %51 {offsets = [0, 40], sizes = [8, 4], strides = [1, 1]} : vector<8x64xf32> to vector<8x4xf32>
    %77 = arith.addf %75, %76 : vector<8x4xf32>
    %78 = vector.extract_strided_slice %51 {offsets = [0, 44], sizes = [8, 4], strides = [1, 1]} : vector<8x64xf32> to vector<8x4xf32>
    %79 = arith.addf %77, %78 : vector<8x4xf32>
    %80 = vector.extract_strided_slice %51 {offsets = [0, 48], sizes = [8, 4], strides = [1, 1]} : vector<8x64xf32> to vector<8x4xf32>
    %81 = arith.addf %79, %80 : vector<8x4xf32>
    %82 = vector.extract_strided_slice %51 {offsets = [0, 52], sizes = [8, 4], strides = [1, 1]} : vector<8x64xf32> to vector<8x4xf32>
    %83 = arith.addf %81, %82 : vector<8x4xf32>
    %84 = vector.extract_strided_slice %51 {offsets = [0, 56], sizes = [8, 4], strides = [1, 1]} : vector<8x64xf32> to vector<8x4xf32>
    %85 = arith.addf %83, %84 : vector<8x4xf32>
    %86 = vector.extract_strided_slice %51 {offsets = [0, 60], sizes = [8, 4], strides = [1, 1]} : vector<8x64xf32> to vector<8x4xf32>
    %87 = arith.addf %85, %86 : vector<8x4xf32>
    %cst_18 = arith.constant 6.250000e-02 : f32
    %88 = vector.broadcast %cst_18 : f32 to vector<8x4xf32>
    %89 = arith.mulf %87, %88 : vector<8x4xf32>
    %90 = arith.index_cast %48 : i32 to index
    %c0_19 = arith.constant 0 : index
    %91 = vector.load %arg9[%90, %c0_19] : memref<32x4xf32, #tpu.memory_space<vmem>>, vector<8x4xf32>
    tpu.vector_store %arg9[%90, %c0_19], %89 {strides = array<i32>} : memref<32x4xf32, #tpu.memory_space<vmem>>, vector<8x4xf32>,
    %c2_i32 = arith.constant 2 : i32
    %c0_20 = arith.constant 0 : index
    %c0_21 = arith.constant 0 : index
    %92 = vector.load %arg10[%c0_20, %c0_21] : memref<1x64xf32, #tpu.memory_space<vmem>>, vector<1x4xf32>
    %cst_22 = arith.constant 6.250000e-02 : f32
    %93 = vector.broadcast %cst_22 : f32 to vector<1x4xf32>
    %94 = arith.mulf %92, %93 : vector<1x4xf32>
    %c16 = arith.constant 16 : index
    %c0_23 = arith.constant 0 : index
    %95 = vector.load %arg9[%c16, %c0_23] : memref<32x4xf32, #tpu.memory_space<vmem>>, vector<1x4xf32>
    tpu.vector_store %arg9[%c16, %c0_23], %94 {strides = array<i32>} : memref<32x4xf32, #tpu.memory_space<vmem>>, vector<1x4xf32>,
    %c0_24 = arith.constant 0 : index
    %c4 = arith.constant 4 : index
    %96 = vector.load %arg10[%c0_24, %c4] : memref<1x64xf32, #tpu.memory_space<vmem>>, vector<1x4xf32>
    %cst_25 = arith.constant 6.250000e-02 : f32
    %97 = vector.broadcast %cst_25 : f32 to vector<1x4xf32>
    %98 = arith.mulf %96, %97 : vector<1x4xf32>
    %c17 = arith.constant 17 : index
    %c0_26 = arith.constant 0 : index
    %99 = vector.load %arg9[%c17, %c0_26] : memref<32x4xf32, #tpu.memory_space<vmem>>, vector<1x4xf32>
    tpu.vector_store %arg9[%c17, %c0_26], %98 {strides = array<i32>} : memref<32x4xf32, #tpu.memory_space<vmem>>, vector<1x4xf32>,
    %c0_27 = arith.constant 0 : index
    %c8 = arith.constant 8 : index
    %100 = vector.load %arg10[%c0_27, %c8] : memref<1x64xf32, #tpu.memory_space<vmem>>, vector<1x4xf32>
    %cst_28 = arith.constant 6.250000e-02 : f32
    %101 = vector.broadcast %cst_28 : f32 to vector<1x4xf32>
    %102 = arith.mulf %100, %101 : vector<1x4xf32>
    %c18 = arith.constant 18 : index
    %c0_29 = arith.constant 0 : index
    %103 = vector.load %arg9[%c18, %c0_29] : memref<32x4xf32, #tpu.memory_space<vmem>>, vector<1x4xf32>
    tpu.vector_store %arg9[%c18, %c0_29], %102 {strides = array<i32>} : memref<32x4xf32, #tpu.memory_space<vmem>>, vector<1x4xf32>,
    %c0_30 = arith.constant 0 : index
    %c12 = arith.constant 12 : index
    %104 = vector.load %arg10[%c0_30, %c12] : memref<1x64xf32, #tpu.memory_space<vmem>>, vector<1x4xf32>
    %cst_31 = arith.constant 6.250000e-02 : f32
    %105 = vector.broadcast %cst_31 : f32 to vector<1x4xf32>
    %106 = arith.mulf %104, %105 : vector<1x4xf32>
    %c19 = arith.constant 19 : index
    %c0_32 = arith.constant 0 : index
    %107 = vector.load %arg9[%c19, %c0_32] : memref<32x4xf32, #tpu.memory_space<vmem>>, vector<1x4xf32>
    tpu.vector_store %arg9[%c19, %c0_32], %106 {strides = array<i32>} : memref<32x4xf32, #tpu.memory_space<vmem>>, vector<1x4xf32>,
    %c0_33 = arith.constant 0 : index
    %c16_34 = arith.constant 16 : index
    %108 = vector.load %arg10[%c0_33, %c16_34] : memref<1x64xf32, #tpu.memory_space<vmem>>, vector<1x4xf32>
    %cst_35 = arith.constant 6.250000e-02 : f32
    %109 = vector.broadcast %cst_35 : f32 to vector<1x4xf32>
    %110 = arith.mulf %108, %109 : vector<1x4xf32>
    %c20 = arith.constant 20 : index
    %c0_36 = arith.constant 0 : index
    %111 = vector.load %arg9[%c20, %c0_36] : memref<32x4xf32, #tpu.memory_space<vmem>>, vector<1x4xf32>
    tpu.vector_store %arg9[%c20, %c0_36], %110 {strides = array<i32>} : memref<32x4xf32, #tpu.memory_space<vmem>>, vector<1x4xf32>,
    %c0_37 = arith.constant 0 : index
    %c20_38 = arith.constant 20 : index
    %112 = vector.load %arg10[%c0_37, %c20_38] : memref<1x64xf32, #tpu.memory_space<vmem>>, vector<1x4xf32>
    %cst_39 = arith.constant 6.250000e-02 : f32
    %113 = vector.broadcast %cst_39 : f32 to vector<1x4xf32>
    %114 = arith.mulf %112, %113 : vector<1x4xf32>
    %c21 = arith.constant 21 : index
    %c0_40 = arith.constant 0 : index
    %115 = vector.load %arg9[%c21, %c0_40] : memref<32x4xf32, #tpu.memory_space<vmem>>, vector<1x4xf32>
    tpu.vector_store %arg9[%c21, %c0_40], %114 {strides = array<i32>} : memref<32x4xf32, #tpu.memory_space<vmem>>, vector<1x4xf32>,
    %c0_41 = arith.constant 0 : index
    %c24 = arith.constant 24 : index
    %116 = vector.load %arg10[%c0_41, %c24] : memref<1x64xf32, #tpu.memory_space<vmem>>, vector<1x4xf32>
    %cst_42 = arith.constant 6.250000e-02 : f32
    %117 = vector.broadcast %cst_42 : f32 to vector<1x4xf32>
    %118 = arith.mulf %116, %117 : vector<1x4xf32>
    %c22 = arith.constant 22 : index
    %c0_43 = arith.constant 0 : index
    %119 = vector.load %arg9[%c22, %c0_43] : memref<32x4xf32, #tpu.memory_space<vmem>>, vector<1x4xf32>
    tpu.vector_store %arg9[%c22, %c0_43], %118 {strides = array<i32>} : memref<32x4xf32, #tpu.memory_space<vmem>>, vector<1x4xf32>,
    %c0_44 = arith.constant 0 : index
    %c28 = arith.constant 28 : index
    %120 = vector.load %arg10[%c0_44, %c28] : memref<1x64xf32, #tpu.memory_space<vmem>>, vector<1x4xf32>
    %cst_45 = arith.constant 6.250000e-02 : f32
    %121 = vector.broadcast %cst_45 : f32 to vector<1x4xf32>
    %122 = arith.mulf %120, %121 : vector<1x4xf32>
    %c23 = arith.constant 23 : index
    %c0_46 = arith.constant 0 : index
    %123 = vector.load %arg9[%c23, %c0_46] : memref<32x4xf32, #tpu.memory_space<vmem>>, vector<1x4xf32>
    tpu.vector_store %arg9[%c23, %c0_46], %122 {strides = array<i32>} : memref<32x4xf32, #tpu.memory_space<vmem>>, vector<1x4xf32>,
    %c0_47 = arith.constant 0 : index
    %c32 = arith.constant 32 : index
    %124 = vector.load %arg10[%c0_47, %c32] : memref<1x64xf32, #tpu.memory_space<vmem>>, vector<1x4xf32>
    %cst_48 = arith.constant 6.250000e-02 : f32
    %125 = vector.broadcast %cst_48 : f32 to vector<1x4xf32>
    %126 = arith.mulf %124, %125 : vector<1x4xf32>
    %c24_49 = arith.constant 24 : index
    %c0_50 = arith.constant 0 : index
    %127 = vector.load %arg9[%c24_49, %c0_50] : memref<32x4xf32, #tpu.memory_space<vmem>>, vector<1x4xf32>
    tpu.vector_store %arg9[%c24_49, %c0_50], %126 {strides = array<i32>} : memref<32x4xf32, #tpu.memory_space<vmem>>, vector<1x4xf32>,
    %c0_51 = arith.constant 0 : index
    %c36 = arith.constant 36 : index
    %128 = vector.load %arg10[%c0_51, %c36] : memref<1x64xf32, #tpu.memory_space<vmem>>, vector<1x4xf32>
    %cst_52 = arith.constant 6.250000e-02 : f32
    %129 = vector.broadcast %cst_52 : f32 to vector<1x4xf32>
    %130 = arith.mulf %128, %129 : vector<1x4xf32>
    %c25 = arith.constant 25 : index
    %c0_53 = arith.constant 0 : index
    %131 = vector.load %arg9[%c25, %c0_53] : memref<32x4xf32, #tpu.memory_space<vmem>>, vector<1x4xf32>
    tpu.vector_store %arg9[%c25, %c0_53], %130 {strides = array<i32>} : memref<32x4xf32, #tpu.memory_space<vmem>>, vector<1x4xf32>,
    %c0_54 = arith.constant 0 : index
    %c40 = arith.constant 40 : index
    %132 = vector.load %arg10[%c0_54, %c40] : memref<1x64xf32, #tpu.memory_space<vmem>>, vector<1x4xf32>
    %cst_55 = arith.constant 6.250000e-02 : f32
    %133 = vector.broadcast %cst_55 : f32 to vector<1x4xf32>
    %134 = arith.mulf %132, %133 : vector<1x4xf32>
    %c26 = arith.constant 26 : index
    %c0_56 = arith.constant 0 : index
    %135 = vector.load %arg9[%c26, %c0_56] : memref<32x4xf32, #tpu.memory_space<vmem>>, vector<1x4xf32>
    tpu.vector_store %arg9[%c26, %c0_56], %134 {strides = array<i32>} : memref<32x4xf32, #tpu.memory_space<vmem>>, vector<1x4xf32>,
    %c0_57 = arith.constant 0 : index
    %c44 = arith.constant 44 : index
    %136 = vector.load %arg10[%c0_57, %c44] : memref<1x64xf32, #tpu.memory_space<vmem>>, vector<1x4xf32>
    %cst_58 = arith.constant 6.250000e-02 : f32
    %137 = vector.broadcast %cst_58 : f32 to vector<1x4xf32>
    %138 = arith.mulf %136, %137 : vector<1x4xf32>
    %c27 = arith.constant 27 : index
    %c0_59 = arith.constant 0 : index
    %139 = vector.load %arg9[%c27, %c0_59] : memref<32x4xf32, #tpu.memory_space<vmem>>, vector<1x4xf32>
    tpu.vector_store %arg9[%c27, %c0_59], %138 {strides = array<i32>} : memref<32x4xf32, #tpu.memory_space<vmem>>, vector<1x4xf32>,
    %c0_60 = arith.constant 0 : index
    %c48 = arith.constant 48 : index
    %140 = vector.load %arg10[%c0_60, %c48] : memref<1x64xf32, #tpu.memory_space<vmem>>, vector<1x4xf32>
    %cst_61 = arith.constant 6.250000e-02 : f32
    %141 = vector.broadcast %cst_61 : f32 to vector<1x4xf32>
    %142 = arith.mulf %140, %141 : vector<1x4xf32>
    %c28_62 = arith.constant 28 : index
    %c0_63 = arith.constant 0 : index
    %143 = vector.load %arg9[%c28_62, %c0_63] : memref<32x4xf32, #tpu.memory_space<vmem>>, vector<1x4xf32>
    tpu.vector_store %arg9[%c28_62, %c0_63], %142 {strides = array<i32>} : memref<32x4xf32, #tpu.memory_space<vmem>>, vector<1x4xf32>,
    %c0_64 = arith.constant 0 : index
    %c52 = arith.constant 52 : index
    %144 = vector.load %arg10[%c0_64, %c52] : memref<1x64xf32, #tpu.memory_space<vmem>>, vector<1x4xf32>
    %cst_65 = arith.constant 6.250000e-02 : f32
    %145 = vector.broadcast %cst_65 : f32 to vector<1x4xf32>
    %146 = arith.mulf %144, %145 : vector<1x4xf32>
    %c29 = arith.constant 29 : index
    %c0_66 = arith.constant 0 : index
    %147 = vector.load %arg9[%c29, %c0_66] : memref<32x4xf32, #tpu.memory_space<vmem>>, vector<1x4xf32>
    tpu.vector_store %arg9[%c29, %c0_66], %146 {strides = array<i32>} : memref<32x4xf32, #tpu.memory_space<vmem>>, vector<1x4xf32>,
    %c0_67 = arith.constant 0 : index
    %c56 = arith.constant 56 : index
    %148 = vector.load %arg10[%c0_67, %c56] : memref<1x64xf32, #tpu.memory_space<vmem>>, vector<1x4xf32>
    %cst_68 = arith.constant 6.250000e-02 : f32
    %149 = vector.broadcast %cst_68 : f32 to vector<1x4xf32>
    %150 = arith.mulf %148, %149 : vector<1x4xf32>
    %c30 = arith.constant 30 : index
    %c0_69 = arith.constant 0 : index
    %151 = vector.load %arg9[%c30, %c0_69] : memref<32x4xf32, #tpu.memory_space<vmem>>, vector<1x4xf32>
    tpu.vector_store %arg9[%c30, %c0_69], %150 {strides = array<i32>} : memref<32x4xf32, #tpu.memory_space<vmem>>, vector<1x4xf32>,
    %c0_70 = arith.constant 0 : index
    %c60 = arith.constant 60 : index
    %152 = vector.load %arg10[%c0_70, %c60] : memref<1x64xf32, #tpu.memory_space<vmem>>, vector<1x4xf32>
    %cst_71 = arith.constant 6.250000e-02 : f32
    %153 = vector.broadcast %cst_71 : f32 to vector<1x4xf32>
    %154 = arith.mulf %152, %153 : vector<1x4xf32>
    %c31 = arith.constant 31 : index
    %c0_72 = arith.constant 0 : index
    %155 = vector.load %arg9[%c31, %c0_72] : memref<32x4xf32, #tpu.memory_space<vmem>>, vector<1x4xf32>
    tpu.vector_store %arg9[%c31, %c0_72], %154 {strides = array<i32>} : memref<32x4xf32, #tpu.memory_space<vmem>>, vector<1x4xf32>,
    %c0_73 = arith.constant 0 : index
    %c0_74 = arith.constant 0 : index
    %156 = vector.load %arg9[%c0_73, %c0_74] : memref<32x4xf32, #tpu.memory_space<vmem>>, vector<32x4xf32>
    %c0_75 = arith.constant 0 : index
    %c0_76 = arith.constant 0 : index
    %157 = vector.load %arg2[%c0_75, %c0_76] : memref<4x8xf32, #tpu.memory_space<vmem>>, vector<4x8xf32>
    %cst_77 = arith.constant dense<0.000000e+00> : vector<32x8xf32>
    %158 = tpu.matmul %156, %157, %cst_77 {dimension_numbers = #tpu.dot_dimension_numbers<[1], [0], [0], [1], [0, 0, 1, 1], [], []>} : vector<32x4xf32>, vector<4x8xf32>, vector<32x8xf32> -> vector<32x8xf32>
    %c0_78 = arith.constant 0 : index
    %c0_79 = arith.constant 0 : index
    %159 = vector.load %arg3[%c0_78, %c0_79] : memref<1x8xf32, #tpu.memory_space<vmem>>, vector<1x8xf32>
    %160 = vector.broadcast %159 : vector<1x8xf32> to vector<32x8xf32>
    %161 = arith.addf %158, %160 : vector<32x8xf32>
    %cst_80 = arith.constant 3.000000e+00 : f32
    %162 = vector.broadcast %cst_80 : f32 to vector<32x8xf32>
    %163 = arith.addf %161, %162 : vector<32x8xf32>
    %cst_81 = arith.constant 0.000000e+00 : f32
    %cst_82 = arith.constant 6.000000e+00 : f32
    %164 = vector.broadcast %cst_81 : f32 to vector<32x8xf32>
    %165 = arith.maximumf %164, %163 : vector<32x8xf32>
    %166 = vector.broadcast %cst_82 : f32 to vector<32x8xf32>
    %167 = arith.minimumf %166, %165 : vector<32x8xf32>
    %168 = arith.mulf %161, %167 : vector<32x8xf32>
    %cst_83 = arith.constant 0.166666672 : f32
    %169 = vector.broadcast %cst_83 : f32 to vector<32x8xf32>
    %170 = arith.mulf %168, %169 : vector<32x8xf32>
    %171 = vector.extract_strided_slice %170 {offsets = [0, 0], sizes = [16, 8], strides = [1, 1]} : vector<32x8xf32> to vector<16x8xf32>
    %c0_84 = arith.constant 0 : index
    %c0_85 = arith.constant 0 : index
    %172 = vector.load %arg4[%c0_84, %c0_85] : memref<8x4xf32, #tpu.memory_space<vmem>>, vector<8x4xf32>
    %cst_86 = arith.constant dense<0.000000e+00> : vector<16x4xf32>
    %173 = tpu.matmul %171, %172, %cst_86 {dimension_numbers = #tpu.dot_dimension_numbers<[1], [0], [0], [1], [0, 0, 1, 1], [], []>} : vector<16x8xf32>, vector<8x4xf32>, vector<16x4xf32> -> vector<16x4xf32>
    %c0_87 = arith.constant 0 : index
    %c0_88 = arith.constant 0 : index
    %174 = vector.load %arg5[%c0_87, %c0_88] : memref<1x4xf32, #tpu.memory_space<vmem>>, vector<1x4xf32>
    %175 = vector.broadcast %174 : vector<1x4xf32> to vector<16x4xf32>
    %176 = arith.addf %173, %175 : vector<16x4xf32>
    %177 = arith.negf %176 : vector<16x4xf32>
    %178 = math.exp %177 : vector<16x4xf32>
    %cst_89 = arith.constant 1.000000e+00 : f32
    %179 = vector.broadcast %cst_89 : f32 to vector<16x4xf32>
    %180 = arith.addf %179, %178 : vector<16x4xf32>
    %181 = arith.divf %179, %180 : vector<16x4xf32>
    %182 = vector.extract_strided_slice %170 {offsets = [16, 0], sizes = [16, 8], strides = [1, 1]} : vector<32x8xf32> to vector<16x8xf32>
    %c0_90 = arith.constant 0 : index
    %c0_91 = arith.constant 0 : index
    %183 = vector.load %arg6[%c0_90, %c0_91] : memref<8x4xf32, #tpu.memory_space<vmem>>, vector<8x4xf32>
    %cst_92 = arith.constant dense<0.000000e+00> : vector<16x4xf32>
    %184 = tpu.matmul %182, %183, %cst_92 {dimension_numbers = #tpu.dot_dimension_numbers<[1], [0], [0], [1], [0, 0, 1, 1], [], []>} : vector<16x8xf32>, vector<8x4xf32>, vector<16x4xf32> -> vector<16x4xf32>
    %c0_93 = arith.constant 0 : index
    %c0_94 = arith.constant 0 : index
    %185 = vector.load %arg7[%c0_93, %c0_94] : memref<1x4xf32, #tpu.memory_space<vmem>>, vector<1x4xf32>
    %186 = vector.broadcast %185 : vector<1x4xf32> to vector<16x4xf32>
    %187 = arith.addf %184, %186 : vector<16x4xf32>
    %188 = arith.negf %187 : vector<16x4xf32>
    %189 = math.exp %188 : vector<16x4xf32>
    %cst_95 = arith.constant 1.000000e+00 : f32
    %190 = vector.broadcast %cst_95 : f32 to vector<16x4xf32>
    %191 = arith.addf %190, %189 : vector<16x4xf32>
    %192 = arith.divf %190, %191 : vector<16x4xf32>
    %c0_96 = arith.constant 0 : index
    %c0_97 = arith.constant 0 : index
    %193 = vector.load %arg9[%c0_96, %c0_97] : memref<32x4xf32, #tpu.memory_space<vmem>>, vector<16x4xf32>
    tpu.vector_store %arg9[%c0_96, %c0_97], %181 {strides = array<i32>} : memref<32x4xf32, #tpu.memory_space<vmem>>, vector<16x4xf32>,
    %c0_i32_98 = arith.constant 0 : i32
    %c8_i32_99 = arith.constant 8 : i32
    %194 = arith.muli %c0_i32_98, %c8_i32_99 : i32
    %195 = tpu.assume_multiple %194, 8 : i32
    %196 = arith.index_cast %195 : i32 to index
    %c0_100 = arith.constant 0 : index
    %197 = vector.load %arg9[%196, %c0_100] : memref<32x4xf32, #tpu.memory_space<vmem>>, vector<8x4xf32>
    %198 = vector.extract_strided_slice %192 {offsets = [0, 0], sizes = [1, 4], strides = [1, 1]} : vector<16x4xf32> to vector<1x4xf32>
    %199 = vector.broadcast %198 : vector<1x4xf32> to vector<8x4xf32>
    %200 = arith.mulf %197, %199 : vector<8x4xf32>
    %cst_101 = arith.constant 1.000000e+00 : f32
    %201 = vector.broadcast %cst_101 : f32 to vector<8x4xf32>
    %202 = arith.addf %201, %200 : vector<8x4xf32>
    %c0_102 = arith.constant 0 : index
    %c0_103 = arith.constant 0 : index
    %203 = vector.load %arg11[%c0_102, %c0_103] : memref<8x64xf32, #tpu.memory_space<vmem>>, vector<8x4xf32>
    tpu.vector_store %arg11[%c0_102, %c0_103], %202 {strides = array<i32>} : memref<8x64xf32, #tpu.memory_space<vmem>>, vector<8x4xf32>,
    %204 = vector.extract_strided_slice %192 {offsets = [1, 0], sizes = [1, 4], strides = [1, 1]} : vector<16x4xf32> to vector<1x4xf32>
    %205 = vector.broadcast %204 : vector<1x4xf32> to vector<8x4xf32>
    %206 = arith.mulf %197, %205 : vector<8x4xf32>
    %cst_104 = arith.constant 1.000000e+00 : f32
    %207 = vector.broadcast %cst_104 : f32 to vector<8x4xf32>
    %208 = arith.addf %207, %206 : vector<8x4xf32>
    %c0_105 = arith.constant 0 : index
    %c4_106 = arith.constant 4 : index
    %209 = vector.load %arg11[%c0_105, %c4_106] : memref<8x64xf32, #tpu.memory_space<vmem>>, vector<8x4xf32>
    tpu.vector_store %arg11[%c0_105, %c4_106], %208 {strides = array<i32>} : memref<8x64xf32, #tpu.memory_space<vmem>>, vector<8x4xf32>,
    %210 = vector.extract_strided_slice %192 {offsets = [2, 0], sizes = [1, 4], strides = [1, 1]} : vector<16x4xf32> to vector<1x4xf32>
    %211 = vector.broadcast %210 : vector<1x4xf32> to vector<8x4xf32>
    %212 = arith.mulf %197, %211 : vector<8x4xf32>
    %cst_107 = arith.constant 1.000000e+00 : f32
    %213 = vector.broadcast %cst_107 : f32 to vector<8x4xf32>
    %214 = arith.addf %213, %212 : vector<8x4xf32>
    %c0_108 = arith.constant 0 : index
    %c8_109 = arith.constant 8 : index
    %215 = vector.load %arg11[%c0_108, %c8_109] : memref<8x64xf32, #tpu.memory_space<vmem>>, vector<8x4xf32>
    tpu.vector_store %arg11[%c0_108, %c8_109], %214 {strides = array<i32>} : memref<8x64xf32, #tpu.memory_space<vmem>>, vector<8x4xf32>,
    %216 = vector.extract_strided_slice %192 {offsets = [3, 0], sizes = [1, 4], strides = [1, 1]} : vector<16x4xf32> to vector<1x4xf32>
    %217 = vector.broadcast %216 : vector<1x4xf32> to vector<8x4xf32>
    %218 = arith.mulf %197, %217 : vector<8x4xf32>
    %cst_110 = arith.constant 1.000000e+00 : f32
    %219 = vector.broadcast %cst_110 : f32 to vector<8x4xf32>
    %220 = arith.addf %219, %218 : vector<8x4xf32>
    %c0_111 = arith.constant 0 : index
    %c12_112 = arith.constant 12 : index
    %221 = vector.load %arg11[%c0_111, %c12_112] : memref<8x64xf32, #tpu.memory_space<vmem>>, vector<8x4xf32>
    tpu.vector_store %arg11[%c0_111, %c12_112], %220 {strides = array<i32>} : memref<8x64xf32, #tpu.memory_space<vmem>>, vector<8x4xf32>,
    %222 = vector.extract_strided_slice %192 {offsets = [4, 0], sizes = [1, 4], strides = [1, 1]} : vector<16x4xf32> to vector<1x4xf32>
    %223 = vector.broadcast %222 : vector<1x4xf32> to vector<8x4xf32>
    %224 = arith.mulf %197, %223 : vector<8x4xf32>
    %cst_113 = arith.constant 1.000000e+00 : f32
    %225 = vector.broadcast %cst_113 : f32 to vector<8x4xf32>
    %226 = arith.addf %225, %224 : vector<8x4xf32>
    %c0_114 = arith.constant 0 : index
    %c16_115 = arith.constant 16 : index
    %227 = vector.load %arg11[%c0_114, %c16_115] : memref<8x64xf32, #tpu.memory_space<vmem>>, vector<8x4xf32>
    tpu.vector_store %arg11[%c0_114, %c16_115], %226 {strides = array<i32>} : memref<8x64xf32, #tpu.memory_space<vmem>>, vector<8x4xf32>,
    %228 = vector.extract_strided_slice %192 {offsets = [5, 0], sizes = [1, 4], strides = [1, 1]} : vector<16x4xf32> to vector<1x4xf32>
    %229 = vector.broadcast %228 : vector<1x4xf32> to vector<8x4xf32>
    %230 = arith.mulf %197, %229 : vector<8x4xf32>
    %cst_116 = arith.constant 1.000000e+00 : f32
    %231 = vector.broadcast %cst_116 : f32 to vector<8x4xf32>
    %232 = arith.addf %231, %230 : vector<8x4xf32>
    %c0_117 = arith.constant 0 : index
    %c20_118 = arith.constant 20 : index
    %233 = vector.load %arg11[%c0_117, %c20_118] : memref<8x64xf32, #tpu.memory_space<vmem>>, vector<8x4xf32>
    tpu.vector_store %arg11[%c0_117, %c20_118], %232 {strides = array<i32>} : memref<8x64xf32, #tpu.memory_space<vmem>>, vector<8x4xf32>,
    %234 = vector.extract_strided_slice %192 {offsets = [6, 0], sizes = [1, 4], strides = [1, 1]} : vector<16x4xf32> to vector<1x4xf32>
    %235 = vector.broadcast %234 : vector<1x4xf32> to vector<8x4xf32>
    %236 = arith.mulf %197, %235 : vector<8x4xf32>
    %cst_119 = arith.constant 1.000000e+00 : f32
    %237 = vector.broadcast %cst_119 : f32 to vector<8x4xf32>
    %238 = arith.addf %237, %236 : vector<8x4xf32>
    %c0_120 = arith.constant 0 : index
    %c24_121 = arith.constant 24 : index
    %239 = vector.load %arg11[%c0_120, %c24_121] : memref<8x64xf32, #tpu.memory_space<vmem>>, vector<8x4xf32>
    tpu.vector_store %arg11[%c0_120, %c24_121], %238 {strides = array<i32>} : memref<8x64xf32, #tpu.memory_space<vmem>>, vector<8x4xf32>,
    %240 = vector.extract_strided_slice %192 {offsets = [7, 0], sizes = [1, 4], strides = [1, 1]} : vector<16x4xf32> to vector<1x4xf32>
    %241 = vector.broadcast %240 : vector<1x4xf32> to vector<8x4xf32>
    %242 = arith.mulf %197, %241 : vector<8x4xf32>
    %cst_122 = arith.constant 1.000000e+00 : f32
    %243 = vector.broadcast %cst_122 : f32 to vector<8x4xf32>
    %244 = arith.addf %243, %242 : vector<8x4xf32>
    %c0_123 = arith.constant 0 : index
    %c28_124 = arith.constant 28 : index
    %245 = vector.load %arg11[%c0_123, %c28_124] : memref<8x64xf32, #tpu.memory_space<vmem>>, vector<8x4xf32>
    tpu.vector_store %arg11[%c0_123, %c28_124], %244 {strides = array<i32>} : memref<8x64xf32, #tpu.memory_space<vmem>>, vector<8x4xf32>,
    %246 = vector.extract_strided_slice %192 {offsets = [8, 0], sizes = [1, 4], strides = [1, 1]} : vector<16x4xf32> to vector<1x4xf32>
    %247 = vector.broadcast %246 : vector<1x4xf32> to vector<8x4xf32>
    %248 = arith.mulf %197, %247 : vector<8x4xf32>
    %cst_125 = arith.constant 1.000000e+00 : f32
    %249 = vector.broadcast %cst_125 : f32 to vector<8x4xf32>
    %250 = arith.addf %249, %248 : vector<8x4xf32>
    %c0_126 = arith.constant 0 : index
    %c32_127 = arith.constant 32 : index
    %251 = vector.load %arg11[%c0_126, %c32_127] : memref<8x64xf32, #tpu.memory_space<vmem>>, vector<8x4xf32>
    tpu.vector_store %arg11[%c0_126, %c32_127], %250 {strides = array<i32>} : memref<8x64xf32, #tpu.memory_space<vmem>>, vector<8x4xf32>,
    %252 = vector.extract_strided_slice %192 {offsets = [9, 0], sizes = [1, 4], strides = [1, 1]} : vector<16x4xf32> to vector<1x4xf32>
    %253 = vector.broadcast %252 : vector<1x4xf32> to vector<8x4xf32>
    %254 = arith.mulf %197, %253 : vector<8x4xf32>
    %cst_128 = arith.constant 1.000000e+00 : f32
    %255 = vector.broadcast %cst_128 : f32 to vector<8x4xf32>
    %256 = arith.addf %255, %254 : vector<8x4xf32>
    %c0_129 = arith.constant 0 : index
    %c36_130 = arith.constant 36 : index
    %257 = vector.load %arg11[%c0_129, %c36_130] : memref<8x64xf32, #tpu.memory_space<vmem>>, vector<8x4xf32>
    tpu.vector_store %arg11[%c0_129, %c36_130], %256 {strides = array<i32>} : memref<8x64xf32, #tpu.memory_space<vmem>>, vector<8x4xf32>,
    %258 = vector.extract_strided_slice %192 {offsets = [10, 0], sizes = [1, 4], strides = [1, 1]} : vector<16x4xf32> to vector<1x4xf32>
    %259 = vector.broadcast %258 : vector<1x4xf32> to vector<8x4xf32>
    %260 = arith.mulf %197, %259 : vector<8x4xf32>
    %cst_131 = arith.constant 1.000000e+00 : f32
    %261 = vector.broadcast %cst_131 : f32 to vector<8x4xf32>
    %262 = arith.addf %261, %260 : vector<8x4xf32>
    %c0_132 = arith.constant 0 : index
    %c40_133 = arith.constant 40 : index
    %263 = vector.load %arg11[%c0_132, %c40_133] : memref<8x64xf32, #tpu.memory_space<vmem>>, vector<8x4xf32>
    tpu.vector_store %arg11[%c0_132, %c40_133], %262 {strides = array<i32>} : memref<8x64xf32, #tpu.memory_space<vmem>>, vector<8x4xf32>,
    %264 = vector.extract_strided_slice %192 {offsets = [11, 0], sizes = [1, 4], strides = [1, 1]} : vector<16x4xf32> to vector<1x4xf32>
    %265 = vector.broadcast %264 : vector<1x4xf32> to vector<8x4xf32>
    %266 = arith.mulf %197, %265 : vector<8x4xf32>
    %cst_134 = arith.constant 1.000000e+00 : f32
    %267 = vector.broadcast %cst_134 : f32 to vector<8x4xf32>
    %268 = arith.addf %267, %266 : vector<8x4xf32>
    %c0_135 = arith.constant 0 : index
    %c44_136 = arith.constant 44 : index
    %269 = vector.load %arg11[%c0_135, %c44_136] : memref<8x64xf32, #tpu.memory_space<vmem>>, vector<8x4xf32>
    tpu.vector_store %arg11[%c0_135, %c44_136], %268 {strides = array<i32>} : memref<8x64xf32, #tpu.memory_space<vmem>>, vector<8x4xf32>,
    %270 = vector.extract_strided_slice %192 {offsets = [12, 0], sizes = [1, 4], strides = [1, 1]} : vector<16x4xf32> to vector<1x4xf32>
    %271 = vector.broadcast %270 : vector<1x4xf32> to vector<8x4xf32>
    %272 = arith.mulf %197, %271 : vector<8x4xf32>
    %cst_137 = arith.constant 1.000000e+00 : f32
    %273 = vector.broadcast %cst_137 : f32 to vector<8x4xf32>
    %274 = arith.addf %273, %272 : vector<8x4xf32>
    %c0_138 = arith.constant 0 : index
    %c48_139 = arith.constant 48 : index
    %275 = vector.load %arg11[%c0_138, %c48_139] : memref<8x64xf32, #tpu.memory_space<vmem>>, vector<8x4xf32>
    tpu.vector_store %arg11[%c0_138, %c48_139], %274 {strides = array<i32>} : memref<8x64xf32, #tpu.memory_space<vmem>>, vector<8x4xf32>,
    %276 = vector.extract_strided_slice %192 {offsets = [13, 0], sizes = [1, 4], strides = [1, 1]} : vector<16x4xf32> to vector<1x4xf32>
    %277 = vector.broadcast %276 : vector<1x4xf32> to vector<8x4xf32>
    %278 = arith.mulf %197, %277 : vector<8x4xf32>
    %cst_140 = arith.constant 1.000000e+00 : f32
    %279 = vector.broadcast %cst_140 : f32 to vector<8x4xf32>
    %280 = arith.addf %279, %278 : vector<8x4xf32>
    %c0_141 = arith.constant 0 : index
    %c52_142 = arith.constant 52 : index
    %281 = vector.load %arg11[%c0_141, %c52_142] : memref<8x64xf32, #tpu.memory_space<vmem>>, vector<8x4xf32>
    tpu.vector_store %arg11[%c0_141, %c52_142], %280 {strides = array<i32>} : memref<8x64xf32, #tpu.memory_space<vmem>>, vector<8x4xf32>,
    %282 = vector.extract_strided_slice %192 {offsets = [14, 0], sizes = [1, 4], strides = [1, 1]} : vector<16x4xf32> to vector<1x4xf32>
    %283 = vector.broadcast %282 : vector<1x4xf32> to vector<8x4xf32>
    %284 = arith.mulf %197, %283 : vector<8x4xf32>
    %cst_143 = arith.constant 1.000000e+00 : f32
    %285 = vector.broadcast %cst_143 : f32 to vector<8x4xf32>
    %286 = arith.addf %285, %284 : vector<8x4xf32>
    %c0_144 = arith.constant 0 : index
    %c56_145 = arith.constant 56 : index
    %287 = vector.load %arg11[%c0_144, %c56_145] : memref<8x64xf32, #tpu.memory_space<vmem>>, vector<8x4xf32>
    tpu.vector_store %arg11[%c0_144, %c56_145], %286 {strides = array<i32>} : memref<8x64xf32, #tpu.memory_space<vmem>>, vector<8x4xf32>,
    %288 = vector.extract_strided_slice %192 {offsets = [15, 0], sizes = [1, 4], strides = [1, 1]} : vector<16x4xf32> to vector<1x4xf32>
    %289 = vector.broadcast %288 : vector<1x4xf32> to vector<8x4xf32>
    %290 = arith.mulf %197, %289 : vector<8x4xf32>
    %cst_146 = arith.constant 1.000000e+00 : f32
    %291 = vector.broadcast %cst_146 : f32 to vector<8x4xf32>
    %292 = arith.addf %291, %290 : vector<8x4xf32>
    %c0_147 = arith.constant 0 : index
    %c60_148 = arith.constant 60 : index
    %293 = vector.load %arg11[%c0_147, %c60_148] : memref<8x64xf32, #tpu.memory_space<vmem>>, vector<8x4xf32>
    tpu.vector_store %arg11[%c0_147, %c60_148], %292 {strides = array<i32>} : memref<8x64xf32, #tpu.memory_space<vmem>>, vector<8x4xf32>,
    %c0_149 = arith.constant 0 : index
    %294 = arith.index_cast %195 : i32 to index
    %c0_150 = arith.constant 0 : index
    %295 = vector.load %arg1[%c0_149, %294, %c0_150] : memref<1x16x64xf32, #tpu.memory_space<vmem>>, vector<1x8x64xf32>
    %296 = vector.shape_cast %295 : vector<1x8x64xf32> to vector<8x64xf32>
    %c0_151 = arith.constant 0 : index
    %c0_152 = arith.constant 0 : index
    %297 = vector.load %arg11[%c0_151, %c0_152] : memref<8x64xf32, #tpu.memory_space<vmem>>, vector<8x64xf32>
    %298 = arith.mulf %296, %297 : vector<8x64xf32>
    %c0_153 = arith.constant 0 : index
    %299 = arith.index_cast %195 : i32 to index
    %c0_154 = arith.constant 0 : index
    %300 = vector.load %arg8[%c0_153, %299, %c0_154] : memref<1x16x64xf32, #tpu.memory_space<vmem>>, vector<1x8x64xf32>
    %301 = vector.shape_cast %300 : vector<1x8x64xf32> to vector<8x64xf32>
    %302 = vector.shape_cast %298 : vector<8x64xf32> to vector<1x8x64xf32>
    tpu.vector_store %arg8[%c0_153, %299, %c0_154], %302 {strides = array<i32>} : memref<1x16x64xf32, #tpu.memory_space<vmem>>, vector<1x8x64xf32>,
    %c1_i32_155 = arith.constant 1 : i32
    %c8_i32_156 = arith.constant 8 : i32
    %303 = arith.muli %c1_i32_155, %c8_i32_156 : i32
    %304 = tpu.assume_multiple %303, 8 : i32
    %305 = arith.index_cast %304 : i32 to index
    %c0_157 = arith.constant 0 : index
    %306 = vector.load %arg9[%305, %c0_157] : memref<32x4xf32, #tpu.memory_space<vmem>>, vector<8x4xf32>
    %307 = vector.extract_strided_slice %192 {offsets = [0, 0], sizes = [1, 4], strides = [1, 1]} : vector<16x4xf32> to vector<1x4xf32>
    %308 = vector.broadcast %307 : vector<1x4xf32> to vector<8x4xf32>
    %309 = arith.mulf %306, %308 : vector<8x4xf32>
    %cst_158 = arith.constant 1.000000e+00 : f32
    %310 = vector.broadcast %cst_158 : f32 to vector<8x4xf32>
    %311 = arith.addf %310, %309 : vector<8x4xf32>
    %c0_159 = arith.constant 0 : index
    %c0_160 = arith.constant 0 : index
    %312 = vector.load %arg11[%c0_159, %c0_160] : memref<8x64xf32, #tpu.memory_space<vmem>>, vector<8x4xf32>
    tpu.vector_store %arg11[%c0_159, %c0_160], %311 {strides = array<i32>} : memref<8x64xf32, #tpu.memory_space<vmem>>, vector<8x4xf32>,
    %313 = vector.extract_strided_slice %192 {offsets = [1, 0], sizes = [1, 4], strides = [1, 1]} : vector<16x4xf32> to vector<1x4xf32>
    %314 = vector.broadcast %313 : vector<1x4xf32> to vector<8x4xf32>
    %315 = arith.mulf %306, %314 : vector<8x4xf32>
    %cst_161 = arith.constant 1.000000e+00 : f32
    %316 = vector.broadcast %cst_161 : f32 to vector<8x4xf32>
    %317 = arith.addf %316, %315 : vector<8x4xf32>
    %c0_162 = arith.constant 0 : index
    %c4_163 = arith.constant 4 : index
    %318 = vector.load %arg11[%c0_162, %c4_163] : memref<8x64xf32, #tpu.memory_space<vmem>>, vector<8x4xf32>
    tpu.vector_store %arg11[%c0_162, %c4_163], %317 {strides = array<i32>} : memref<8x64xf32, #tpu.memory_space<vmem>>, vector<8x4xf32>,
    %319 = vector.extract_strided_slice %192 {offsets = [2, 0], sizes = [1, 4], strides = [1, 1]} : vector<16x4xf32> to vector<1x4xf32>
    %320 = vector.broadcast %319 : vector<1x4xf32> to vector<8x4xf32>
    %321 = arith.mulf %306, %320 : vector<8x4xf32>
    %cst_164 = arith.constant 1.000000e+00 : f32
    %322 = vector.broadcast %cst_164 : f32 to vector<8x4xf32>
    %323 = arith.addf %322, %321 : vector<8x4xf32>
    %c0_165 = arith.constant 0 : index
    %c8_166 = arith.constant 8 : index
    %324 = vector.load %arg11[%c0_165, %c8_166] : memref<8x64xf32, #tpu.memory_space<vmem>>, vector<8x4xf32>
    tpu.vector_store %arg11[%c0_165, %c8_166], %323 {strides = array<i32>} : memref<8x64xf32, #tpu.memory_space<vmem>>, vector<8x4xf32>,
    %325 = vector.extract_strided_slice %192 {offsets = [3, 0], sizes = [1, 4], strides = [1, 1]} : vector<16x4xf32> to vector<1x4xf32>
    %326 = vector.broadcast %325 : vector<1x4xf32> to vector<8x4xf32>
    %327 = arith.mulf %306, %326 : vector<8x4xf32>
    %cst_167 = arith.constant 1.000000e+00 : f32
    %328 = vector.broadcast %cst_167 : f32 to vector<8x4xf32>
    %329 = arith.addf %328, %327 : vector<8x4xf32>
    %c0_168 = arith.constant 0 : index
    %c12_169 = arith.constant 12 : index
    %330 = vector.load %arg11[%c0_168, %c12_169] : memref<8x64xf32, #tpu.memory_space<vmem>>, vector<8x4xf32>
    tpu.vector_store %arg11[%c0_168, %c12_169], %329 {strides = array<i32>} : memref<8x64xf32, #tpu.memory_space<vmem>>, vector<8x4xf32>,
    %331 = vector.extract_strided_slice %192 {offsets = [4, 0], sizes = [1, 4], strides = [1, 1]} : vector<16x4xf32> to vector<1x4xf32>
    %332 = vector.broadcast %331 : vector<1x4xf32> to vector<8x4xf32>
    %333 = arith.mulf %306, %332 : vector<8x4xf32>
    %cst_170 = arith.constant 1.000000e+00 : f32
    %334 = vector.broadcast %cst_170 : f32 to vector<8x4xf32>
    %335 = arith.addf %334, %333 : vector<8x4xf32>
    %c0_171 = arith.constant 0 : index
    %c16_172 = arith.constant 16 : index
    %336 = vector.load %arg11[%c0_171, %c16_172] : memref<8x64xf32, #tpu.memory_space<vmem>>, vector<8x4xf32>
    tpu.vector_store %arg11[%c0_171, %c16_172], %335 {strides = array<i32>} : memref<8x64xf32, #tpu.memory_space<vmem>>, vector<8x4xf32>,
    %337 = vector.extract_strided_slice %192 {offsets = [5, 0], sizes = [1, 4], strides = [1, 1]} : vector<16x4xf32> to vector<1x4xf32>
    %338 = vector.broadcast %337 : vector<1x4xf32> to vector<8x4xf32>
    %339 = arith.mulf %306, %338 : vector<8x4xf32>
    %cst_173 = arith.constant 1.000000e+00 : f32
    %340 = vector.broadcast %cst_173 : f32 to vector<8x4xf32>
    %341 = arith.addf %340, %339 : vector<8x4xf32>
    %c0_174 = arith.constant 0 : index
    %c20_175 = arith.constant 20 : index
    %342 = vector.load %arg11[%c0_174, %c20_175] : memref<8x64xf32, #tpu.memory_space<vmem>>, vector<8x4xf32>
    tpu.vector_store %arg11[%c0_174, %c20_175], %341 {strides = array<i32>} : memref<8x64xf32, #tpu.memory_space<vmem>>, vector<8x4xf32>,
    %343 = vector.extract_strided_slice %192 {offsets = [6, 0], sizes = [1, 4], strides = [1, 1]} : vector<16x4xf32> to vector<1x4xf32>
    %344 = vector.broadcast %343 : vector<1x4xf32> to vector<8x4xf32>
    %345 = arith.mulf %306, %344 : vector<8x4xf32>
    %cst_176 = arith.constant 1.000000e+00 : f32
    %346 = vector.broadcast %cst_176 : f32 to vector<8x4xf32>
    %347 = arith.addf %346, %345 : vector<8x4xf32>
    %c0_177 = arith.constant 0 : index
    %c24_178 = arith.constant 24 : index
    %348 = vector.load %arg11[%c0_177, %c24_178] : memref<8x64xf32, #tpu.memory_space<vmem>>, vector<8x4xf32>
    tpu.vector_store %arg11[%c0_177, %c24_178], %347 {strides = array<i32>} : memref<8x64xf32, #tpu.memory_space<vmem>>, vector<8x4xf32>,
    %349 = vector.extract_strided_slice %192 {offsets = [7, 0], sizes = [1, 4], strides = [1, 1]} : vector<16x4xf32> to vector<1x4xf32>
    %350 = vector.broadcast %349 : vector<1x4xf32> to vector<8x4xf32>
    %351 = arith.mulf %306, %350 : vector<8x4xf32>
    %cst_179 = arith.constant 1.000000e+00 : f32
    %352 = vector.broadcast %cst_179 : f32 to vector<8x4xf32>
    %353 = arith.addf %352, %351 : vector<8x4xf32>
    %c0_180 = arith.constant 0 : index
    %c28_181 = arith.constant 28 : index
    %354 = vector.load %arg11[%c0_180, %c28_181] : memref<8x64xf32, #tpu.memory_space<vmem>>, vector<8x4xf32>
    tpu.vector_store %arg11[%c0_180, %c28_181], %353 {strides = array<i32>} : memref<8x64xf32, #tpu.memory_space<vmem>>, vector<8x4xf32>,
    %355 = vector.extract_strided_slice %192 {offsets = [8, 0], sizes = [1, 4], strides = [1, 1]} : vector<16x4xf32> to vector<1x4xf32>
    %356 = vector.broadcast %355 : vector<1x4xf32> to vector<8x4xf32>
    %357 = arith.mulf %306, %356 : vector<8x4xf32>
    %cst_182 = arith.constant 1.000000e+00 : f32
    %358 = vector.broadcast %cst_182 : f32 to vector<8x4xf32>
    %359 = arith.addf %358, %357 : vector<8x4xf32>
    %c0_183 = arith.constant 0 : index
    %c32_184 = arith.constant 32 : index
    %360 = vector.load %arg11[%c0_183, %c32_184] : memref<8x64xf32, #tpu.memory_space<vmem>>, vector<8x4xf32>
    tpu.vector_store %arg11[%c0_183, %c32_184], %359 {strides = array<i32>} : memref<8x64xf32, #tpu.memory_space<vmem>>, vector<8x4xf32>,
    %361 = vector.extract_strided_slice %192 {offsets = [9, 0], sizes = [1, 4], strides = [1, 1]} : vector<16x4xf32> to vector<1x4xf32>
    %362 = vector.broadcast %361 : vector<1x4xf32> to vector<8x4xf32>
    %363 = arith.mulf %306, %362 : vector<8x4xf32>
    %cst_185 = arith.constant 1.000000e+00 : f32
    %364 = vector.broadcast %cst_185 : f32 to vector<8x4xf32>
    %365 = arith.addf %364, %363 : vector<8x4xf32>
    %c0_186 = arith.constant 0 : index
    %c36_187 = arith.constant 36 : index
    %366 = vector.load %arg11[%c0_186, %c36_187] : memref<8x64xf32, #tpu.memory_space<vmem>>, vector<8x4xf32>
    tpu.vector_store %arg11[%c0_186, %c36_187], %365 {strides = array<i32>} : memref<8x64xf32, #tpu.memory_space<vmem>>, vector<8x4xf32>,
    %367 = vector.extract_strided_slice %192 {offsets = [10, 0], sizes = [1, 4], strides = [1, 1]} : vector<16x4xf32> to vector<1x4xf32>
    %368 = vector.broadcast %367 : vector<1x4xf32> to vector<8x4xf32>
    %369 = arith.mulf %306, %368 : vector<8x4xf32>
    %cst_188 = arith.constant 1.000000e+00 : f32
    %370 = vector.broadcast %cst_188 : f32 to vector<8x4xf32>
    %371 = arith.addf %370, %369 : vector<8x4xf32>
    %c0_189 = arith.constant 0 : index
    %c40_190 = arith.constant 40 : index
    %372 = vector.load %arg11[%c0_189, %c40_190] : memref<8x64xf32, #tpu.memory_space<vmem>>, vector<8x4xf32>
    tpu.vector_store %arg11[%c0_189, %c40_190], %371 {strides = array<i32>} : memref<8x64xf32, #tpu.memory_space<vmem>>, vector<8x4xf32>,
    %373 = vector.extract_strided_slice %192 {offsets = [11, 0], sizes = [1, 4], strides = [1, 1]} : vector<16x4xf32> to vector<1x4xf32>
    %374 = vector.broadcast %373 : vector<1x4xf32> to vector<8x4xf32>
    %375 = arith.mulf %306, %374 : vector<8x4xf32>
    %cst_191 = arith.constant 1.000000e+00 : f32
    %376 = vector.broadcast %cst_191 : f32 to vector<8x4xf32>
    %377 = arith.addf %376, %375 : vector<8x4xf32>
    %c0_192 = arith.constant 0 : index
    %c44_193 = arith.constant 44 : index
    %378 = vector.load %arg11[%c0_192, %c44_193] : memref<8x64xf32, #tpu.memory_space<vmem>>, vector<8x4xf32>
    tpu.vector_store %arg11[%c0_192, %c44_193], %377 {strides = array<i32>} : memref<8x64xf32, #tpu.memory_space<vmem>>, vector<8x4xf32>,
    %379 = vector.extract_strided_slice %192 {offsets = [12, 0], sizes = [1, 4], strides = [1, 1]} : vector<16x4xf32> to vector<1x4xf32>
    %380 = vector.broadcast %379 : vector<1x4xf32> to vector<8x4xf32>
    %381 = arith.mulf %306, %380 : vector<8x4xf32>
    %cst_194 = arith.constant 1.000000e+00 : f32
    %382 = vector.broadcast %cst_194 : f32 to vector<8x4xf32>
    %383 = arith.addf %382, %381 : vector<8x4xf32>
    %c0_195 = arith.constant 0 : index
    %c48_196 = arith.constant 48 : index
    %384 = vector.load %arg11[%c0_195, %c48_196] : memref<8x64xf32, #tpu.memory_space<vmem>>, vector<8x4xf32>
    tpu.vector_store %arg11[%c0_195, %c48_196], %383 {strides = array<i32>} : memref<8x64xf32, #tpu.memory_space<vmem>>, vector<8x4xf32>,
    %385 = vector.extract_strided_slice %192 {offsets = [13, 0], sizes = [1, 4], strides = [1, 1]} : vector<16x4xf32> to vector<1x4xf32>
    %386 = vector.broadcast %385 : vector<1x4xf32> to vector<8x4xf32>
    %387 = arith.mulf %306, %386 : vector<8x4xf32>
    %cst_197 = arith.constant 1.000000e+00 : f32
    %388 = vector.broadcast %cst_197 : f32 to vector<8x4xf32>
    %389 = arith.addf %388, %387 : vector<8x4xf32>
    %c0_198 = arith.constant 0 : index
    %c52_199 = arith.constant 52 : index
    %390 = vector.load %arg11[%c0_198, %c52_199] : memref<8x64xf32, #tpu.memory_space<vmem>>, vector<8x4xf32>
    tpu.vector_store %arg11[%c0_198, %c52_199], %389 {strides = array<i32>} : memref<8x64xf32, #tpu.memory_space<vmem>>, vector<8x4xf32>,
    %391 = vector.extract_strided_slice %192 {offsets = [14, 0], sizes = [1, 4], strides = [1, 1]} : vector<16x4xf32> to vector<1x4xf32>
    %392 = vector.broadcast %391 : vector<1x4xf32> to vector<8x4xf32>
    %393 = arith.mulf %306, %392 : vector<8x4xf32>
    %cst_200 = arith.constant 1.000000e+00 : f32
    %394 = vector.broadcast %cst_200 : f32 to vector<8x4xf32>
    %395 = arith.addf %394, %393 : vector<8x4xf32>
    %c0_201 = arith.constant 0 : index
    %c56_202 = arith.constant 56 : index
    %396 = vector.load %arg11[%c0_201, %c56_202] : memref<8x64xf32, #tpu.memory_space<vmem>>, vector<8x4xf32>
    tpu.vector_store %arg11[%c0_201, %c56_202], %395 {strides = array<i32>} : memref<8x64xf32, #tpu.memory_space<vmem>>, vector<8x4xf32>,
    %397 = vector.extract_strided_slice %192 {offsets = [15, 0], sizes = [1, 4], strides = [1, 1]} : vector<16x4xf32> to vector<1x4xf32>
    %398 = vector.broadcast %397 : vector<1x4xf32> to vector<8x4xf32>
    %399 = arith.mulf %306, %398 : vector<8x4xf32>
    %cst_203 = arith.constant 1.000000e+00 : f32
    %400 = vector.broadcast %cst_203 : f32 to vector<8x4xf32>
    %401 = arith.addf %400, %399 : vector<8x4xf32>
    %c0_204 = arith.constant 0 : index
    %c60_205 = arith.constant 60 : index
    %402 = vector.load %arg11[%c0_204, %c60_205] : memref<8x64xf32, #tpu.memory_space<vmem>>, vector<8x4xf32>
    tpu.vector_store %arg11[%c0_204, %c60_205], %401 {strides = array<i32>} : memref<8x64xf32, #tpu.memory_space<vmem>>, vector<8x4xf32>,
    %c0_206 = arith.constant 0 : index
    %403 = arith.index_cast %304 : i32 to index
    %c0_207 = arith.constant 0 : index
    %404 = vector.load %arg1[%c0_206, %403, %c0_207] : memref<1x16x64xf32, #tpu.memory_space<vmem>>, vector<1x8x64xf32>
    %405 = vector.shape_cast %404 : vector<1x8x64xf32> to vector<8x64xf32>
    %c0_208 = arith.constant 0 : index
    %c0_209 = arith.constant 0 : index
    %406 = vector.load %arg11[%c0_208, %c0_209] : memref<8x64xf32, #tpu.memory_space<vmem>>, vector<8x64xf32>
    %407 = arith.mulf %405, %406 : vector<8x64xf32>
    %c0_210 = arith.constant 0 : index
    %408 = arith.index_cast %304 : i32 to index
    %c0_211 = arith.constant 0 : index
    %409 = vector.load %arg8[%c0_210, %408, %c0_211] : memref<1x16x64xf32, #tpu.memory_space<vmem>>, vector<1x8x64xf32>
    %410 = vector.shape_cast %409 : vector<1x8x64xf32> to vector<8x64xf32>
    %411 = vector.shape_cast %407 : vector<8x64xf32> to vector<1x8x64xf32>
    tpu.vector_store %arg8[%c0_210, %408, %c0_211], %411 {strides = array<i32>} : memref<1x16x64xf32, #tpu.memory_space<vmem>>, vector<1x8x64xf32>,
    %c2_i32_212 = arith.constant 2 : i32
    return
  }
  func.func @transform_0(%arg0: i32) -> (i32, i32, i32) {
    %c0_i32 = arith.constant 0 : i32
    %c0_i32_0 = arith.constant 0 : i32
    %c0_i32_1 = arith.constant 0 : i32
    return %arg0, %c0_i32, %c0_i32_0 : i32, i32, i32
  }
  func.func @transform_1(%arg0: i32) -> (i32, i32) {
    %c0_i32 = arith.constant 0 : i32
    %c0_i32_0 = arith.constant 0 : i32
    %c0_i32_1 = arith.constant 0 : i32
    return %c0_i32, %c0_i32_0 : i32, i32
  }
  func.func @transform_2(%arg0: i32) -> (i32, i32) {
    %c0_i32 = arith.constant 0 : i32
    %c0_i32_0 = arith.constant 0 : i32
    %c0_i32_1 = arith.constant 0 : i32
    return %c0_i32, %c0_i32_0 : i32, i32
  }
  func.func @transform_3(%arg0: i32) -> (i32, i32) {
    %c0_i32 = arith.constant 0 : i32
    %c0_i32_0 = arith.constant 0 : i32
    %c0_i32_1 = arith.constant 0 : i32
    return %c0_i32, %c0_i32_0 : i32, i32
  }
  func.func @transform_4(%arg0: i32) -> (i32, i32) {
    %c0_i32 = arith.constant 0 : i32
    %c0_i32_0 = arith.constant 0 : i32
    %c0_i32_1 = arith.constant 0 : i32
    return %c0_i32, %c0_i32_0 : i32, i32
  }
  func.func @transform_5(%arg0: i32) -> (i32, i32) {
    %c0_i32 = arith.constant 0 : i32
    %c0_i32_0 = arith.constant 0 : i32
    %c0_i32_1 = arith.constant 0 : i32
    return %c0_i32, %c0_i32_0 : i32, i32
  }
  func.func @transform_6(%arg0: i32) -> (i32, i32) {
    %c0_i32 = arith.constant 0 : i32
    %c0_i32_0 = arith.constant 0 : i32
    %c0_i32_1 = arith.constant 0 : i32
    return %c0_i32, %c0_i32_0 : i32, i32
  }
  func.func @transform_7(%arg0: i32) -> (i32, i32, i32) {
    %c0_i32 = arith.constant 0 : i32
    %c0_i32_0 = arith.constant 0 : i32
    %c0_i32_1 = arith.constant 0 : i32
    return %arg0, %c0_i32, %c0_i32_0 : i32, i32, i32
  }
}

</mosaic_0001>

<bundles_post_ra>
// kernel: tpu_custom_call.1
= control target key start
LH: loop header
LB: loop body
LE: loop exit
PB: predicated region body
PF: predicated region fallthrough
CT: control target
= control target key end

     0   :  { %12 = vsyncpa [#allocation6], 0  ;;  %s1899_s0 = inlined_call_operand.hbm [shape: f32[2,16,64], index: 0, kind: input, shape index: {}]   ;;  %s1900_s1 = inlined_call_operand.vmem [shape: f32[4,8], index: 1, kind: input, shape index: {}]   ;;  %s1901_s2 = inlined_call_operand.vmem [shape: f32[1,8], index: 2, kind: input, shape index: {}]   ;;  %s1902_s3 = inlined_call_operand.vmem [shape: f32[8,4], index: 3, kind: input, shape index: {}]   ;;  %s1903_s4 = inlined_call_operand.vmem [shape: f32[1,4], index: 4, kind: input, shape index: {}]   ;;  %s1904_s5 = inlined_call_operand.vmem [shape: f32[8,4], index: 5, kind: input, shape index: {}]   ;;  %s1905_s6 = inlined_call_operand.vmem [shape: f32[1,4], index: 6, kind: input, shape index: {}]   ;;  %s1906_s7 = inlined_call_operand.hbm [shape: f32[2,16,64], index: 7, kind: output, shape index: {}]  }
   0x1   :  { %14 = vsyncpa [#allocation6 + $0x1], 0 }
   0x2   :  { %15 = vsyncpa [#allocation7], 0 }
   0x3   :  { %17 = vsyncpa [#allocation7 + $0x1], 0  ;;  %s1449_s24 = smov 0   ;;  %s1451_s25 = smov 0  }
   0x4   :  { %s1453_s26 = smov 0   ;;  %s1455_s27 = smov 0  }
   0x5 LB: > { %s1470_s28 = sadd.s32 4294967295, %s1373_s27   ;;  %s1145_s29 = sadd.s32 4294967294, %s1373_s27   ;;  %s1373_s27 = sphi %s1455_s27, %s1923_s27   ;;  %s1369_s26 = sphi %s1453_s26, %s1922_s26   ;;  %s1365_s25 = sphi %s1451_s25, %s1921_s25   ;;  %s1361_s24 = sphi %s1449_s24, %s1920_s24  }
   0x6   : > { %s1474_s30 = sadd.s32 1, %s1373_s27   ;;  %s30_s8 = sadd.s32 1, %s1369_s26 }
   0x7   : > { %s27_s9 = ssub.s32 %s1373_s27, %s1474_s30  ;;  %p37_p0 = scmp.ne.s32.totalorder %s1369_s26, %s1365_s25 }
   0x8   : > { %p28_p1 = scmp.eq.s32.totalorder %s27_s9, 0  ;;  %p38_p2 = scmp.eq.s32.totalorder %s1373_s27, 0 }
   0x9   : > { %p43_p3 = scmp.ne.s32.totalorder %s1365_s25, %s1361_s24  ;;  %p44_p4 = scmp.eq.s32.totalorder %s1470_s28, 0 }
   0xa   : > { %s1486_s10 = scalar_select %p28_p1, %s1369_s26, %s30_s8  }
   0xb   : > { %p1488_p5 = por %p38_p2, %p37_p0  ;;  %p1492_p6 = por %p44_p4, %p43_p3 }
   0xc   : > { %1909 = sst [smem:[#allocation11_spill]] %s1486_s10  ;;  %p193_p7 = scmp.eq.s32.totalorder %s1470_s28, 1 }
   0xd   : > { %p199_p8 = scmp.eq.s32.totalorder %s1145_s29, 1  ;;  %p1190_p10 = scmp.lt.s32.totalorder %s1373_s27, 2 }
   0xe   : > { %p1499_p11 = por %p193_p7, %p37_p0  ;;  %s237_s15 = sand.u32 1, %s1369_s26  }
   0xf   : > { %p1503_p12 = por %p199_p8, %p43_p3  ;;  %s1175_s16 = sshll.u32 %s1373_s27, 4 }
  0x10   : > { %s1148_s17 = sshll.u32 %s237_s15, 4  ;;  %s246_s20 = scalar_lea.hbm %s1899_s0, %s1175_s16 }
  0x11   : > { %s247_s21 = sshll.u32 %s246_s20, 4  ;;  %s241_s22 = scalar_lea.vmem [#allocation5], %s1148_s17  ;;  %s248_s21 = int_to_ptr.hbm [resolvable:$true] %s247_s21 }
  0x12   : > { %s249_s23 = sshll.u32 %s241_s22, 4  ;;  %p1514_p13 = pnand %p1190_p10, %p1488_p5  ;;  %s250_s23 = int_to_ptr.vmem [resolvable:$true] %s249_s23 }
  0x13   : > { %p1151_p0 = scmp.ge.s32.totalorder %s1373_s27, 1  ;;  %p257_p1 = scmp.lt.s32.totalorder %s1373_s27, 3 }
  0x14   : > { %s238_s8 = scalar_lea.sflag [#allocation6], %s237_s15  ;;  %s1277_s9 = sshra.s32 %s248_s21, 4  ;;  %s1278_s9 = int_to_ptr.hbm [resolvable:$true] %s1277_s9 }
  0x15   : > { %s1279_s10 = scalar_lea.hbm %s1278_s9, 16  ;;  %p1281_p3 = pneg %p1514_p13 }
  0x16   : > { %p1280_p2 = scmp.ne.s32.totalorder %s1278_s9, %s1279_s10  ;;  %s1284_s11 = scalar_lea.hbm %s1899_s0, 32 }
  0x17   : > { %p1285_p5 = scmp.lt.s32.totalorder %s1278_s9, %s1899_s0  ;;  %p1286_p8 = scmp.lt.s32.totalorder %s1284_s11, %s1279_s10 }
  0x18   : > { %p1282_p4 = pnand %p1281_p3, %p1280_p2 }
  0x19   : > { %p1287_p10 = por %p1286_p8, %p1285_p5 }
  0x1a   : > { %p1283_p7 = pneg %p1282_p4 }
  0x1c   : > { %p1288_p9 = pnand %p1287_p10, %p1283_p7 }
  0x1e   : > { %1291 = shalt.err (!%p1288_p9)
}
  0x1f   : > { %s1375_s15 = smov 128   ;;  %s1376_s20 = smov 8  }
  0x20   : > { %1185 = dma.hbm_to_vmem [thread:$0]  (!%p1514_p13), %s248_s21, 256, %s250_s23, %s238_s8, %s1375_s15, %s1375_s15, %s1376_s20  }
  0x21   : > { %p258_p2 = pnand %p1151_p0, %p257_p1 }
  0x22   : > { %s1535_s22 = sand.u32 (!%p258_p2), 1, %s1365_s25  }
  0x23   : > { %261 = sbr.rel (%p258_p2) target bundleno = 778 (0x30a), region = 48  ;;  %s1907_s10 = sshll.u32 (!%p258_p2), %s1535_s22, 4 }
  0x24   : > { %s264_s9 = scalar_lea.sflag (!%p258_p2), [#allocation6], %s1535_s22  ;;  %s1541_s16 = scalar_lea.vmem (!%p258_p2), [#allocation5], %s1907_s10 }
  0x28   : > { %1352 = dma.done.wait (%p1492_p6), %s264_s9, 256  }
  0x29   : > { %1354 = vsyncadd (%p1492_p6), %s264_s9, 4294967040  ;;  %vm299_vm0 = vcmask 516096   ;;  %v1377_v0 = vmov 0.0   ;;  %vm1908_vm1 = vcmask 523264   ;;  %v1549_v1 = vld [vmem:[%s1541_s16] sm:$0xff]  ;;  %v1552_v2 = vld [vmem:[%s1541_s16 + $0x8] sm:$0xff] }
  0x2a   : > { %300 = vst.msk [vmem:[#allocation3] sm:$0x1] %vm299_vm0, %v1377_v0  ;;  %s1378_s21 = smov 116   ;;  %s1379_s23 = smov 124   ;;  %v304_v3 = vsel %vm1908_vm1, %v1549_v1, 0.0  ;;  %v380_v4 = vsel %vm1908_vm1, %v1552_v2, 0.0 }
  0x2b   : > { %322 = vrot.lane.b32.xlu1 %v1549_v1, %s1378_s21  ;;  %314 = vrot.lane.b32.xlu0 %v1549_v1, %s1379_s23  ;;  %s1380_s12 = smov 108   ;;  %v305_v5 = vrot.slane %v304_v3, 4  ;;  %v381_v6 = vrot.slane %v380_v4, 4  ;;  %s1381_s29 = smov 112   ;;  %vm455_vm2 = vcmask 24576   ;;  %vm598_vm3 = vcmask 1043456  }
  0x2c   : > { %330 = vrot.lane.b32.xlu2 %v1549_v1, %s1380_s12  ;;  %s1382_s8 = smov 120   ;;  %s1383_s17 = smov 104   ;;  %vm375_vm4 = vcmask 31744   ;;  %vm656_vm5 = vcmask 64512   ;;  %vm936_vm1 = vcmask 523744  }
  0x2d   : > { %v306_v7 = vadd.f32 %v305_v5, %v304_v3  ;;  %v382_v8 = vadd.f32 %v381_v6, %v380_v4  ;;  %s1384_s11 = smov 96   ;;  %s1385_s18 = smov 100  }
  0x2e   : > { %s1386_s19 = smov 92   ;;  %s1387_s15 = smov 84  }
  0x2f   : > { %v307_v9 = vrot.slane %v306_v7, 2  ;;  %v383_v11 = vrot.slane %v382_v8, 2  ;;  %s1388_s20 = smov 88   ;;  %s1389_s9 = smov 80  }
  0x30   : > { %s1390_s10 = smov 76  }
  0x31   : > { %v308_v10 = vadd.f32 %v307_v9, %v306_v7  ;;  %v302_v13 = vld [vmem:[#allocation3] sm:$0x1]  ;;  %v384_v15 = vadd.f32 %v383_v11, %v382_v8 }
  0x33   : > { %326 = vrot.lane.b32.xlu1 %v1549_v1, %s1381_s29  ;;  %318 = vrot.lane.b32.xlu0 %v1549_v1, %s1382_s8  ;;  %v309_v12 = vrot.slane %v308_v10, 1  ;;  %v385_v17 = vrot.slane %v384_v15, 1 }
  0x34   : > { %334 = vrot.lane.b32.xlu2 %v1549_v1, %s1383_s17 }
  0x35   : > { %v310_v14 = vadd.f32 %v309_v12, %v308_v10  ;;  %v386_v18 = vadd.f32 %v385_v17, %v384_v15 }
  0x37   : > { %v311_v16 = vadd.f32 %v310_v14, %v302_v13 }
  0x39   : > { %312 = vst.msk [vmem:[#allocation3] sm:$0x1] %vm299_vm0, %v311_v16 }
  0x3b   : > { %342 = vrot.lane.b32.xlu1 %v1549_v1, %s1384_s11  ;;  %338 = vrot.lane.b32.xlu0 %v1549_v1, %s1385_s18 }
  0x3c   : > { %346 = vrot.lane.b32.xlu2 %v1549_v1, %s1386_s19 }
  0x40   : > { %v379_v19 = vld [vmem:[#allocation3] sm:$0x1] }
  0x41   : > { %v387_v20 = vadd.f32 %v386_v18, %v379_v19 }
  0x43   : > { %354 = vrot.lane.b32.xlu1 %v1549_v1, %s1387_s15  ;;  %350 = vrot.lane.b32.xlu0 %v1549_v1, %s1388_s20  ;;  %388 = vst.msk [vmem:[#allocation3] sm:$0x1] %vm299_vm0, %v387_v20 }
  0x44   : > { %358 = vrot.lane.b32.xlu2 %v1549_v1, %s1389_s9 }
  0x4a   : > { %v465_v21 = vld [vmem:[#allocation3] sm:$0x1] }
  0x4b   : > { %362 = vrot.lane.b32.xlu1 %v1549_v1, %s1390_s10  ;;  %390 = vrot.lane.b32.xlu0 %v1552_v2, %s1379_s23  ;;  %v457_v22 = vld [vmem:[#allocation3] sm:$0x1]  ;;  %v466_v24 = vmul.f32 0.0625, %v465_v21 }
  0x4c   : > { %v473_v23 = vld [vmem:[#allocation3] sm:$0x1]  ;;  %394 = vrot.lane.b32.xlu2 %v1552_v2, %s1382_s8  ;;  %v458_v25 = vmul.f32 0.0625, %v457_v22 }
  0x4d   : > { %v474_v26 = vmul.f32 0.0625, %v473_v23  ;;  %v468_v27 = vperm.slane %v466_v24, 0  ;;  %v489_v30 = vld [vmem:[#allocation3] sm:$0x1] }
  0x4e   : > { %v460_v28 = vperm.slane %v458_v25, 0  ;;  %v481_v31 = vld [vmem:[#allocation3] sm:$0x1]  ;;  %v490_v33 = vmul.f32 0.0625, %v489_v30 }
  0x4f   : > { %v476_v29 = vperm.slane %v474_v26, 0  ;;  %v497_v32 = vld [vmem:[#allocation3] sm:$0x1]  ;;  %v482_v34 = vmul.f32 0.0625, %v481_v31 }
  0x50   : > { %v498_v35 = vmul.f32 0.0625, %v497_v32  ;;  %v492_v36 = vperm.slane %v490_v33, 0  ;;  %v505_v39 = vld [vmem:[#allocation3] sm:$0x1] }
  0x51   : > { %v484_v37 = vperm.slane %v482_v34, 0  ;;  %v506_v40 = vmul.f32 0.0625, %v505_v39  ;;  %v513_v42 = vld [vmem:[#allocation3] sm:$0x1] }
  0x52   : > { %v500_v38 = vperm.slane %v498_v35, 0  ;;  %v521_v43 = vld [vmem:[#allocation3] sm:$0x1]  ;;  %v514_v44 = vmul.f32 0.0625, %v513_v42 }
  0x53   : > { %469 = vrot.lane.b32.xlu1 %v468_v27, %s1382_s8  ;;  %461 = vrot.lane.b32.xlu0 %v460_v28, %s1379_s23  ;;  %v508_v41 = vperm.slane %v506_v40, 0  ;;  %s1391_s8 = smov 72   ;;  %s1392_s23 = smov 68   ;;  %v522_v45 = vmul.f32 0.0625, %v521_v43  ;;  %v537_v47 = vld [vmem:[#allocation3] sm:$0x1] }
  0x54   : > { %477 = vrot.lane.b32.xlu2 %v476_v29, %s1378_s21  ;;  %v516_v46 = vperm.slane %v514_v44, 0  ;;  %v529_v48 = vld [vmem:[#allocation3] sm:$0x1]  ;;  %v538_v51 = vmul.f32 0.0625, %v537_v47 }
  0x55   : > { %v524_v49 = vperm.slane %v522_v45, 0  ;;  %v545_v50 = vld [vmem:[#allocation3] sm:$0x1]  ;;  %v530_v52 = vmul.f32 0.0625, %v529_v48 }
  0x56   : > { %v546_v53 = vmul.f32 0.0625, %v545_v50  ;;  %v540_v54 = vperm.slane %v538_v51, 0  ;;  %v561_v56 = vld [vmem:[#allocation3] sm:$0x1] }
  0x57   : > { %v532_v55 = vperm.slane %v530_v52, 0  ;;  %v553_v57 = vld [vmem:[#allocation3] sm:$0x1]  ;;  %v562_v60 = vmul.f32 0.0625, %v561_v56 }
  0x58   : > { %v548_v58 = vperm.slane %v546_v53, 0  ;;  %v569_v59 = vld [vmem:[#allocation3] sm:$0x1]  ;;  %v554_v61 = vmul.f32 0.0625, %v553_v57 }
  0x59   : > { %v570_v62 = vmul.f32 0.0625, %v569_v59  ;;  %v564_v63 = vperm.slane %v562_v60, 0  ;;  %v453_v19 = vld [vmem:[#allocation3] sm:$0x1] }
  0x5a   : > { %v556_v0 = vperm.slane %v554_v61, 0  ;;  %v454_v22 = vmul.f32 0.0625, %v453_v19  ;;  %v581_v24 = vld [vmem:[%s1900_s1] sm:$0xf] }
  0x5b   : > { %493 = vrot.lane.b32.xlu1 %v492_v36, %s1380_s12  ;;  %485 = vrot.lane.b32.xlu0 %v484_v37, %s1381_s29  ;;  %v572_v3 = vperm.slane %v570_v62, 0 }
  0x5c   : > { %501 = vrot.lane.b32.xlu2 %v500_v38, %s1383_s17  ;;  %1177 = vmatpush.msk.msra.mxu3 %vm598_vm3, %v581_v24  ;;  %456 = vst.msk [vmem:[#allocation2 + $0x10] sm:$0x1] %vm455_vm2, %v454_v22 }
  0x5d   : > { %1155 = vmatpush.msk.msra.mxu0 %vm598_vm3, %v581_v24  ;;  %v724_v24 = vld [vmem:[%s1904_s5] sm:$0xff] }
  0x5e   : > { %750 = vmatpush.msra.mxu2 %v724_v24 }
  0x63   : > { %366 = vrot.lane.b32.xlu1 %v1549_v1, %s1391_s8  ;;  %509 = vrot.lane.b32.xlu0 %v508_v41, %s1385_s18 }
  0x64   : > { %398 = vrot.lane.b32.xlu2 %v1552_v2, %s1378_s21  ;;  %s1395_s21 = smov 4  }
  0x6b   : > { %402 = vrot.lane.b32.xlu1 %v1552_v2, %s1381_s29  ;;  %370 = vrot.lane.b32.xlu0 %v1549_v1, %s1392_s23  ;;  %s1397_s29 = smov 20  }
  0x6c   : > { %406 = vrot.lane.b32.xlu2 %v1552_v2, %s1380_s12  ;;  %s1396_s12 = smov 24  }
  0x73   : > { %517 = vrot.lane.b32.xlu1 %v516_v46, %s1384_s11  ;;  %410 = vrot.lane.b32.xlu0 %v1552_v2, %s1383_s17  ;;  %s1398_s17 = smov 16  }
  0x74   : > { %525 = vrot.lane.b32.xlu2 %v524_v49, %s1386_s19 }
  0x7b   : > { %541 = vrot.lane.b32.xlu1 %v540_v54, %s1387_s15  ;;  %533 = vrot.lane.b32.xlu0 %v532_v55, %s1388_s20 }
  0x7c   : > { %549 = vrot.lane.b32.xlu2 %v548_v58, %s1389_s9 }
  0x83   : > { %565 = vrot.lane.b32.xlu1 %v564_v63, %s1391_s8  ;;  %557 = vrot.lane.b32.xlu0 %v556_v0, %s1390_s10 }
  0x84   : > { %573 = vrot.lane.b32.xlu2 %v572_v3, %s1392_s23 }
  0x86   : > { %v331_v4 = vpop.permute.xlu2 %330 }
  0x8b   : > { %414 = vrot.lane.b32.xlu0 %v1552_v2, %s1385_s18  ;;  %418 = vrot.lane.b32.xlu1 %v1552_v2, %s1384_s11  ;;  %s1399_s11 = smov 28   ;;  %s1400_s18 = smov 36  }
  0x8c   : > { %422 = vrot.lane.b32.xlu2 %v1552_v2, %s1386_s19  ;;  %s1401_s19 = smov 32  }
  0x8e   : > { %v335_v5 = vpop.permute.xlu2 %334 }
  0x93   : > { %426 = vrot.lane.b32.xlu0 %v1552_v2, %s1388_s20  ;;  %430 = vrot.lane.b32.xlu1 %v1552_v2, %s1387_s15  ;;  %s1402_s15 = smov 40   ;;  %s1403_s20 = smov 48  }
  0x94   : > { %434 = vrot.lane.b32.xlu2 %v1552_v2, %s1389_s9  ;;  %s1404_s9 = smov 44  }
  0x96   : > { %v347_v6 = vpop.permute.xlu2 %346 }
  0x9b   : > { %438 = vrot.lane.b32.xlu0 %v1552_v2, %s1390_s10  ;;  %442 = vrot.lane.b32.xlu1 %v1552_v2, %s1391_s8  ;;  %s1394_s10 = smov 8   ;;  %s1405_s8 = smov 52  }
  0x9c   : > { %446 = vrot.lane.b32.xlu2 %v1552_v2, %s1392_s23  ;;  %s1393_s23 = smov 12  }
  0x9d   : > { %v323_v7 = vpop.permute.xlu1 %322  ;;  %v315_v8 = vpop.permute.xlu0 %314 }
  0x9e   : > { %v359_v9 = vpop.permute.xlu2 %358  ;;  %v317_v15 = vadd.f32 %v315_v8, %v1549_v1 }
  0xa5   : > { %v327_v10 = vpop.permute.xlu1 %326  ;;  %v319_v11 = vpop.permute.xlu0 %318 }
  0xa6   : > { %v1635_v12 = vpop.permute.xlu2 %394  ;;  %v321_v17 = vadd.f32 %v319_v11, %v317_v15 }
  0xa8   : > { %v325_v18 = vadd.f32 %v323_v7, %v321_v17 }
  0xaa   : > { %v329_v1 = vadd.f32 %v327_v10, %v325_v18 }
  0xac   : > { %v333_v25 = vadd.f32 %v331_v4, %v329_v1  ;;  %v651_v1 = vld [vmem:[%s1902_s3] sm:$0xff] }
  0xad   : > { %v343_v13 = vpop.permute.xlu1 %342  ;;  %v339_v14 = vpop.permute.xlu0 %338  ;;  %678 = vmatpush.msra.mxu1 %v651_v1 }
  0xae   : > { %v478_v16 = vpop.permute.xlu2 %477  ;;  %v337_v29 = vadd.f32 %v335_v5, %v333_v25  ;;  %v1258_v25 = vld [vmem:[%s1901_s2] ss:$0 sm:$0xff] }
  0xaf   : > { %480 = vst.msk [vmem:[#allocation2 + $0x13] sm:$0x1] %vm455_vm2, %v478_v16 }
  0xb0   : > { %v341_v30 = vadd.f32 %v339_v14, %v337_v29 }
  0xb2   : > { %v345_v34 = vadd.f32 %v343_v13, %v341_v30 }
  0xb4   : > { %v349_v35 = vadd.f32 %v347_v6, %v345_v34 }
  0xb5   : > { %v355_v20 = vpop.permute.xlu1 %354  ;;  %v351_v21 = vpop.permute.xlu0 %350 }
  0xb6   : > { %v502_v23 = vpop.permute.xlu2 %501  ;;  %v353_v39 = vadd.f32 %v351_v21, %v349_v35 }
  0xb7   : > { %504 = vst.msk [vmem:[#allocation2 + $0x16] sm:$0x1] %vm455_vm2, %v502_v23 }
  0xb8   : > { %v357_v40 = vadd.f32 %v355_v20, %v353_v39 }
  0xba   : > { %v361_v44 = vadd.f32 %v359_v9, %v357_v40 }
  0xbd   : > { %v363_v26 = vpop.permute.xlu1 %362  ;;  %v391_v27 = vpop.permute.xlu0 %390 }
  0xbe   : > { %v399_v28 = vpop.permute.xlu2 %398  ;;  %v365_v45 = vadd.f32 %v363_v26, %v361_v44  ;;  %v393_v56 = vadd.f32 %v1552_v2, %v391_v27 }
  0xc0   : > { %v397_v59 = vadd.f32 %v1635_v12, %v393_v56 }
  0xc2   : > { %v401_v60 = vadd.f32 %v399_v28, %v397_v59 }
  0xc5   : > { %v470_v31 = vpop.permute.xlu1 %469  ;;  %v462_v32 = vpop.permute.xlu0 %461 }
  0xc6   : > { %472 = vst.msk [vmem:[#allocation2 + $0x12] sm:$0x1] %vm455_vm2, %v470_v31  ;;  %v407_v33 = vpop.permute.xlu2 %406 }
  0xc7   : > { %464 = vst.msk [vmem:[#allocation2 + $0x11] sm:$0x1] %vm455_vm2, %v462_v32 }
  0xcd   : > { %v494_v36 = vpop.permute.xlu1 %493  ;;  %v486_v37 = vpop.permute.xlu0 %485 }
  0xce   : > { %496 = vst.msk [vmem:[#allocation2 + $0x15] sm:$0x1] %vm455_vm2, %v494_v36  ;;  %v526_v38 = vpop.permute.xlu2 %525 }
  0xcf   : > { %488 = vst.msk [vmem:[#allocation2 + $0x14] sm:$0x1] %vm455_vm2, %v486_v37 }
  0xd0   : > { %528 = vst.msk [vmem:[#allocation2 + $0x19] sm:$0x1] %vm455_vm2, %v526_v38 }
  0xd5   : > { %v367_v41 = vpop.permute.xlu1 %366  ;;  %v510_v42 = vpop.permute.xlu0 %509 }
  0xd6   : > { %512 = vst.msk [vmem:[#allocation2 + $0x17] sm:$0x1] %vm455_vm2, %v510_v42  ;;  %v550_v43 = vpop.permute.xlu2 %549  ;;  %v369_v46 = vadd.f32 %v367_v41, %v365_v45 }
  0xd7   : > { %552 = vst.msk [vmem:[#allocation2 + $0x1c] sm:$0x1] %vm455_vm2, %v550_v43 }
  0xdd   : > { %v403_v47 = vpop.permute.xlu1 %402  ;;  %v371_v48 = vpop.permute.xlu0 %370  ;;  %v579_v49 = vld [vmem:[#allocation2 + $0x10] sm:$0xff] }
  0xde   : > { %v373_v50 = vadd.f32 %v371_v48, %v369_v46  ;;  %1158 = vmatmul.msk.f32.vlgmr.msra.gmra.mxu3 %vm375_vm4, %v579_v49  ;;  %v574_v51 = vpop.permute.xlu2 %573  ;;  %v405_v63 = vadd.f32 %v403_v47, %v401_v60 }
  0xdf   : > { %576 = vst.msk [vmem:[#allocation2 + $0x1f] sm:$0x1] %vm455_vm2, %v574_v51 }
  0xe0   : > { %v374_v52 = vmul.f32 0.0625, %v373_v50  ;;  %v409_v0 = vadd.f32 %v407_v33, %v405_v63 }
  0xe2   : > { %376 = vst.msk [vmem:[#allocation2] sm:$0xff] %vm375_vm4, %v374_v52 }
  0xe5   : > { %v518_v53 = vpop.permute.xlu1 %517  ;;  %v411_v54 = vpop.permute.xlu0 %410 }
  0xe6   : > { %520 = vst.msk [vmem:[#allocation2 + $0x18] sm:$0x1] %vm455_vm2, %v518_v53  ;;  %v423_v3 = vpop.permute.xlu2 %422  ;;  %v413_v4 = vadd.f32 %v411_v54, %v409_v0  ;;  %v1681_v54 = vld [vmem:[%s1903_s4] ss:$0 sm:$0xff] }
  0xe9   : > { %v577_v55 = vld [vmem:[#allocation2] sm:$0xff] }
  0xea   : > { %1156 = vmatmul.msk.f32.vlgmr.msra.gmra.mxu0 %vm375_vm4, %v577_v55  ;;  %v1260_v55 = vld [vmem:[%s1905_s6] ss:$0 sm:$0xff] }
  0xed   : > { %v542_v57 = vpop.permute.xlu1 %541  ;;  %v534_v58 = vpop.permute.xlu0 %533 }
  0xee   : > { %544 = vst.msk [vmem:[#allocation2 + $0x1b] sm:$0x1] %vm455_vm2, %v542_v57  ;;  %v435_v10 = vpop.permute.xlu2 %434 }
  0xef   : > { %536 = vst.msk [vmem:[#allocation2 + $0x1a] sm:$0x1] %vm455_vm2, %v534_v58 }
  0xf5   : > { %v566_v61 = vpop.permute.xlu1 %565  ;;  %v558_v62 = vpop.permute.xlu0 %557 }
  0xf6   : > { %568 = vst.msk [vmem:[#allocation2 + $0x1e] sm:$0x1] %vm455_vm2, %v566_v61  ;;  %v447_v19 = vpop.permute.xlu2 %446 }
  0xf7   : > { %560 = vst.msk [vmem:[#allocation2 + $0x1d] sm:$0x1] %vm455_vm2, %v558_v62 }
  0xfd   : > { %v415_v2 = vpop.permute.xlu0 %414  ;;  %v419_v5 = vpop.permute.xlu1 %418 }
  0xfe   : > { %v417_v6 = vadd.f32 %v415_v2, %v413_v4  ;;  %v580_v7 = vld [vmem:[#allocation2 + $0x18] sm:$0xff] }
  0xff   : > { %1159 = vmatmul.msk.f32.gmra.mxu3 %vm375_vm4, %v580_v7 }
 0x100   : > { %v421_v8 = vadd.f32 %v419_v5, %v417_v6 }
 0x102   : > { %v425_v9 = vadd.f32 %v423_v3, %v421_v8 }
 0x105   : > { %v427_v11 = vpop.permute.xlu0 %426  ;;  %v431_v12 = vpop.permute.xlu1 %430 }
 0x106   : > { %v429_v13 = vadd.f32 %v427_v11, %v425_v9 }
 0x108   : > { %v433_v14 = vadd.f32 %v431_v12, %v429_v13 }
 0x10a   : > { %v437_v15 = vadd.f32 %v435_v10, %v433_v14 }
 0x10d   : > { %v439_v16 = vpop.permute.xlu0 %438  ;;  %v443_v17 = vpop.permute.xlu1 %442 }
 0x10e   : > { %v441_v18 = vadd.f32 %v439_v16, %v437_v15 }
 0x110   : > { %v445_v20 = vadd.f32 %v443_v17, %v441_v18 }
 0x112   : > { %v449_v21 = vadd.f32 %v447_v19, %v445_v20 }
 0x114   : > { %v450_v22 = vmul.f32 0.0625, %v449_v21 }
 0x116   : > { %452 = vst.msk [vmem:[#allocation2 + $0x8] sm:$0xff] %vm375_vm4, %v450_v22 }
 0x11d   : > { %v578_v23 = vld [vmem:[#allocation2 + $0x8] sm:$0xff] }
 0x11e   : > { %1157 = vmatmul.msk.f32.gmra.mxu0 %vm375_vm4, %v578_v23 }
 0x161   : > { %v625_v26 = vpop.f32.mrf.mxu3 }
 0x162   : > { %v626_v27 = vadd.f32 %v1258_v25, %v625_v26 }
 0x164   : > { %v633_v28 = vadd.f32 3.0, %v626_v27 }
 0x166   : > { %v637_v29 = vmax.f32 %v633_v28, 0.0 }
 0x167   : > { %v619_v30 = vpop.f32.mrf.mxu0 }
 0x168   : > { %v641_v31 = vmin.f32 %v637_v29, 6.0  ;;  %v620_v32 = vadd.f32 %v1258_v25, %v619_v30 }
 0x16a   : > { %v645_v33 = vmul.f32 %v641_v31, %v626_v27  ;;  %v631_v34 = vadd.f32 3.0, %v620_v32 }
 0x16c   : > { %v649_v35 = vmul.f32 0.16666667, %v645_v33  ;;  %v635_v36 = vmax.f32 %v631_v34, 0.0 }
 0x16e   : > { %v639_v37 = vmin.f32 %v635_v36, 6.0  ;;  %1164 = vmatmul.msk.f32.vlgmr.msra.gmra.mxu2 %vm656_vm5, %v649_v35 }
 0x170   : > { %v643_v38 = vmul.f32 %v639_v37, %v620_v32 }
 0x172   : > { %v647_v39 = vmul.f32 0.16666667, %v643_v38 }
 0x174   : > { %1160 = vmatmul.msk.f32.vlgmr.msra.gmra.mxu1 %vm656_vm5, %v647_v39 }
 0x182   : > { %v628_v40 = vpop.f32.mrf.mxu3 }
 0x183   : > { %v629_v41 = vadd.f32 %v1258_v25, %v628_v40 }
 0x185   : > { %v634_v42 = vadd.f32 3.0, %v629_v41 }
 0x187   : > { %v638_v43 = vmax.f32 %v634_v42, 0.0 }
 0x189   : > { %v642_v44 = vmin.f32 %v638_v43, 6.0 }
 0x18b   : > { %v646_v45 = vmul.f32 %v642_v44, %v629_v41 }
 0x18d   : > { %v650_v46 = vmul.f32 0.16666667, %v646_v45 }
 0x18f   : > { %1165 = vmatmul.msk.f32.gmra.mxu2 %vm656_vm5, %v650_v46 }
 0x19b   : > { %v622_v47 = vpop.f32.mrf.mxu0 }
 0x19c   : > { %v623_v48 = vadd.f32 %v1258_v25, %v622_v47 }
 0x19e   : > { %v632_v49 = vadd.f32 3.0, %v623_v48 }
 0x1a0   : > { %v636_v50 = vmax.f32 %v632_v49, 0.0 }
 0x1a2   : > { %v640_v51 = vmin.f32 %v636_v50, 6.0 }
 0x1a4   : > { %v644_v52 = vmul.f32 %v640_v51, %v623_v48 }
 0x1a6   : > { %v648_v53 = vmul.f32 0.16666667, %v644_v52 }
 0x1a8   : > { %1161 = vmatmul.msk.f32.gmra.mxu1 %vm656_vm5, %v648_v53 }
 0x1f1   : > { %v680_v56 = vpop.f32.mrf.mxu1  ;;  %v752_v57 = vpop.f32.mrf.mxu2 }
 0x1f2   : > { %v681_v58 = vadd.f32 %v1681_v54, %v680_v56  ;;  %v753_v59 = vadd.f32 %v1260_v55, %v752_v57 }
 0x1f4   : > { %v1162_v60 = vmul.f32 -1.442695, %v681_v58  ;;  %v1166_v61 = vmul.f32 -1.442695, %v753_v59 }
 0x1f6   : > { %1261 = vpow2.f32 %v1162_v60 }
 0x1f7   : > { %1263 = vpow2.f32 %v1166_v61 }
 0x1fc   : > { %v1262_v62 = vpop.eup %1261 }
 0x1fd   : > { %v1264_v63 = vpop.eup %1263  ;;  %v692_v0 = vadd.f32 1.0, %v1262_v62 }
 0x1fe   : > { %v764_v3 = vadd.f32 1.0, %v1264_v63 }
 0x1ff   : > { %1265 = vrcp.f32 %v692_v0  ;;  %v705_v8 = vand.u32 2147483648, %v692_v0  ;;  %v703_v11 = vand.u32 2147483647, %v692_v0  ;;  %vm699_vm7 = vweird.f32 %v692_v0 }
 0x200   : > { %1267 = vrcp.f32 %v764_v3  ;;  %v777_v16 = vand.u32 2147483648, %v764_v3  ;;  %vm771_vm11 = vweird.f32 %v764_v3  ;;  %v775_v18 = vand.u32 2147483647, %v764_v3 }
 0x201   : > { %v706_v14 = vor.u32 1.1754944e-38, %v705_v8  ;;  %vm704_vm10 = vcmp.eq.f32.partialorder %v703_v11, 8.507059e+37 }
 0x202   : > { %v778_v21 = vor.u32 1.1754944e-38, %v777_v16  ;;  %vm776_vm13 = vcmp.eq.f32.partialorder %v775_v18, 8.507059e+37 }
 0x205   : > { %v1266_v4 = vpop.eup %1265 }
 0x206   : > { %v1268_v2 = vpop.eup %1267  ;;  %v695_v5 = vmul.f32 %v1266_v4, %v692_v0  ;;  %vm700_vm6 = vweird.f32 %v1266_v4 }
 0x207   : > { %v767_v6 = vmul.f32 %v1268_v2, %v764_v3  ;;  %vm772_vm8 = vweird.f32 %v1268_v2  ;;  %vm701_vm9 = vmor %vm699_vm7, %vm700_vm6 }
 0x208   : > { %v696_v7 = vsub.f32 1.0, %v695_v5  ;;  %vm773_vm12 = vmor %vm771_vm11, %vm772_vm8  ;;  %vm810_vm8 = vcmask 64544   ;;  %vm837_vm11 = vcmask 162944  }
 0x209   : > { %v768_v9 = vsub.f32 1.0, %v767_v6 }
 0x20a   : > { %v697_v10 = vmul.f32 %v1266_v4, %v696_v7 }
 0x20b   : > { %v769_v12 = vmul.f32 %v1268_v2, %v768_v9 }
 0x20c   : > { %v698_v13 = vadd.f32 %v1266_v4, %v697_v10 }
 0x20d   : > { %v770_v15 = vadd.f32 %v1268_v2, %v769_v12 }
 0x20e   : > { %v702_v17 = vsel %vm701_vm9, %v1266_v4, %v698_v13  ;;  %vm819_vm9 = vcmask 97344  }
 0x20f   : > { %v707_v19 = vsel %vm704_vm10, %v706_v14, %v702_v17  ;;  %v774_v20 = vsel %vm773_vm12, %v1268_v2, %v770_v15  ;;  %vm828_vm10 = vcmask 130144   ;;  %vm846_vm12 = vcmask 195744  }
 0x210   : > { %796 = vst.msk [vmem:[#allocation2] sm:$0xff] %vm375_vm4, %v707_v19  ;;  %v1688_v23 = vsel %vm776_vm13, %v778_v21, %v774_v20  ;;  %vm855_vm13 = vcmask 228544  }
 0x211   : > { %v821_v25 = vperm.slane %v1688_v23, 3  ;;  %v812_v26 = vperm.slane %v1688_v23, 2  ;;  %v803_v27 = vperm.slane %v1688_v23, 1  ;;  %v799_v29 = vperm.slane %v1688_v23, 0 }
 0x212   : > { %v755_v22 = vpop.f32.mrf.mxu2  ;;  %v848_v38 = vperm.slane %v1688_v23, 6  ;;  %v839_v39 = vperm.slane %v1688_v23, 5  ;;  %v830_v41 = vperm.slane %v1688_v23, 4  ;;  %v857_v50 = vperm.slane %v1688_v23, 7 }
 0x213   : > { %v756_v24 = vadd.f32 %v1260_v55, %v755_v22 }
 0x215   : > { %v1167_v1 = vmul.f32 -1.442695, %v756_v24 }
 0x217   : > { %v1693_v28 = vld [vmem:[#allocation2] sm:$0xff]  ;;  %1269 = vpow2.f32 %v1167_v1 }
 0x218   : > { %v822_v30 = vmul.f32 %v821_v25, %v1693_v28  ;;  %v813_v31 = vmul.f32 %v812_v26, %v1693_v28  ;;  %v804_v32 = vmul.f32 %v803_v27, %v1693_v28  ;;  %v800_v33 = vmul.f32 %v799_v29, %v1693_v28 }
 0x219   : > { %v849_v43 = vmul.f32 %v848_v38, %v1693_v28  ;;  %v840_v44 = vmul.f32 %v839_v39, %v1693_v28  ;;  %v831_v45 = vmul.f32 %v830_v41, %v1693_v28  ;;  %v858_v55 = vmul.f32 %v857_v50, %v1693_v28 }
 0x21a   : > { %v823_v34 = vadd.f32 1.0, %v822_v30  ;;  %v814_v35 = vadd.f32 1.0, %v813_v31  ;;  %v805_v36 = vadd.f32 1.0, %v804_v32  ;;  %v801_v37 = vadd.f32 1.0, %v800_v33 }
 0x21b   : > { %v850_v46 = vadd.f32 1.0, %v849_v43  ;;  %v841_v47 = vadd.f32 1.0, %v840_v44  ;;  %v832_v48 = vadd.f32 1.0, %v831_v45  ;;  %v859_v61 = vadd.f32 1.0, %v858_v55 }
 0x21c   : > { %825 = vrot.lane.b32.xlu2 %v823_v34, %s1393_s23  ;;  %816 = vrot.lane.b32.xlu1 %v814_v35, %s1394_s10  ;;  %802 = vst.msk [vmem:[#allocation4] sm:$0xff] %vm375_vm4, %v801_v37 }
 0x21d   : > { %v1270_v40 = vpop.eup %1269  ;;  %807 = vrot.lane.b32.xlu0 %v805_v36, %s1395_s21 }
 0x21e   : > { %v765_v42 = vadd.f32 1.0, %v1270_v40 }
 0x220   : > { %1271 = vrcp.f32 %v765_v42  ;;  %v792_v58 = vand.u32 2147483648, %v765_v42  ;;  %v790_v60 = vand.u32 2147483647, %v765_v42  ;;  %vm786_vm15 = vweird.f32 %v765_v42 }
 0x222   : > { %vm791_vm2 = vcmp.eq.f32.partialorder %v790_v60, 8.507059e+37 }
 0x224   : > { %852 = vrot.lane.b32.xlu2 %v850_v46, %s1396_s12  ;;  %843 = vrot.lane.b32.xlu1 %v841_v47, %s1397_s29 }
 0x225   : > { %834 = vrot.lane.b32.xlu0 %v832_v48, %s1398_s17  ;;  %v683_v49 = vpop.f32.mrf.mxu1 }
 0x226   : > { %v1272_v51 = vpop.eup %1271  ;;  %v684_v52 = vadd.f32 %v1681_v54, %v683_v49  ;;  %v793_v54 = vor.u32 1.1754944e-38, %v792_v58 }
 0x227   : > { %v782_v53 = vmul.f32 %v1272_v51, %v765_v42  ;;  %vm787_vm14 = vweird.f32 %v1272_v51 }
 0x228   : > { %v1163_v56 = vmul.f32 -1.442695, %v684_v52  ;;  %vm788_vm0 = vmor %vm786_vm15, %vm787_vm14  ;;  %vm864_vm14 = vcmask 261344   ;;  %vm873_vm15 = vcmask 294144  }
 0x229   : > { %v783_v57 = vsub.f32 1.0, %v782_v53 }
 0x22a   : > { %1273 = vpow2.f32 %v1163_v56 }
 0x22b   : > { %v784_v59 = vmul.f32 %v1272_v51, %v783_v57 }
 0x22d   : > { %v785_v62 = vadd.f32 %v1272_v51, %v784_v59  ;;  %861 = vrot.lane.b32.xlu0 %v859_v61, %s1399_s11 }
 0x22f   : > { %v789_v63 = vsel %vm788_vm0, %v1272_v51, %v785_v62  ;;  %vm882_vm0 = vcmask 326944  }
 0x230   : > { %v1274_v0 = vpop.eup %1273  ;;  %v1733_v3 = vsel %vm791_vm2, %v793_v54, %v789_v63  ;;  %vm891_vm2 = vcmask 359744  }
 0x231   : > { %v693_v4 = vadd.f32 1.0, %v1274_v0  ;;  %v875_v2 = vperm.slane %v1733_v3, 1  ;;  %v866_v5 = vperm.slane %v1733_v3, 0  ;;  %v884_v6 = vperm.slane %v1733_v3, 2 }
 0x232   : > { %v902_v7 = vperm.slane %v1733_v3, 4  ;;  %v893_v8 = vperm.slane %v1733_v3, 3  ;;  %v911_v9 = vperm.slane %v1733_v3, 5  ;;  %v929_v10 = vperm.slane %v1733_v3, 7 }
 0x233   : > { %1275 = vrcp.f32 %v693_v4  ;;  %v876_v11 = vmul.f32 %v875_v2, %v1693_v28  ;;  %v867_v12 = vmul.f32 %v866_v5, %v1693_v28  ;;  %v885_v13 = vmul.f32 %v884_v6, %v1693_v28 }
 0x234   : > { %v903_v14 = vmul.f32 %v902_v7, %v1693_v28  ;;  %v894_v15 = vmul.f32 %v893_v8, %v1693_v28  ;;  %v912_v16 = vmul.f32 %v911_v9, %v1693_v28  ;;  %v930_v17 = vmul.f32 %v929_v10, %v1693_v28 }
 0x235   : > { %v920_v18 = vperm.slane %v1733_v3, 6  ;;  %v720_v24 = vand.u32 2147483648, %v693_v4  ;;  %v718_v30 = vand.u32 2147483647, %v693_v4  ;;  %vm714_vm5 = vweird.f32 %v693_v4 }
 0x236   : > { %v886_v48 = vadd.f32 1.0, %v885_v13  ;;  %v913_v49 = vadd.f32 1.0, %v912_v16  ;;  %v931_v52 = vadd.f32 1.0, %v930_v17 }
 0x237   : > { %v921_v20 = vmul.f32 %v920_v18, %v1693_v28  ;;  %v721_v32 = vor.u32 1.1754944e-38, %v720_v24  ;;  %vm719_vm7 = vcmp.eq.f32.partialorder %v718_v30, 8.507059e+37 }
 0x239   : > { %v1276_v19 = vpop.eup %1275  ;;  %v922_v53 = vadd.f32 1.0, %v921_v20 }
 0x23a   : > { %v710_v21 = vmul.f32 %v1276_v19, %v693_v4  ;;  %vm715_vm3 = vweird.f32 %v1276_v19 }
 0x23b   : > { %vm716_vm6 = vmor %vm714_vm5, %vm715_vm3  ;;  %vm900_vm3 = vcmask 392544   ;;  %vm909_vm5 = vcmask 425344  }
 0x23c   : > { %v711_v22 = vsub.f32 1.0, %v710_v21 }
 0x23e   : > { %v712_v1 = vmul.f32 %v1276_v19, %v711_v22 }
 0x240   : > { %v713_v31 = vadd.f32 %v1276_v19, %v712_v1 }
 0x242   : > { %v717_v33 = vsel %vm716_vm6, %v1276_v19, %v713_v31  ;;  %vm918_vm6 = vcmask 458144  }
 0x243   : > { %v722_v34 = vsel %vm719_vm7, %v721_v32, %v717_v33  ;;  %vm927_vm7 = vcmask 490944  }
 0x244   : > { %797 = vst.msk [vmem:[#allocation2 + $0x8] sm:$0xff] %vm375_vm4, %v722_v34 }
 0x24b   : > { %v1768_v35 = vld [vmem:[#allocation2 + $0x8] sm:$0xff] }
 0x24c   : > { %v960_v28 = vmul.f32 %v1768_v35, %v821_v25  ;;  %v953_v36 = vmul.f32 %v1768_v35, %v812_v26  ;;  %v946_v37 = vmul.f32 %v1768_v35, %v803_v27  ;;  %v981_v25 = vmul.f32 %v1768_v35, %v848_v38 }
 0x24d   : > { %v974_v26 = vmul.f32 %v1768_v35, %v839_v39  ;;  %v1791_v27 = vmul.f32 %v1768_v35, %v799_v29  ;;  %v967_v44 = vmul.f32 %v1768_v35, %v830_v41  ;;  %v877_v38 = vadd.f32 1.0, %v876_v11 }
 0x24e   : > { %v961_v40 = vadd.f32 1.0, %v960_v28  ;;  %v954_v42 = vadd.f32 1.0, %v953_v36  ;;  %v947_v43 = vadd.f32 1.0, %v946_v37  ;;  %v982_v45 = vadd.f32 1.0, %v981_v25 }
 0x24f   : > { %v975_v46 = vadd.f32 1.0, %v974_v26  ;;  %v968_v47 = vadd.f32 1.0, %v967_v44  ;;  %v868_v39 = vadd.f32 1.0, %v867_v12  ;;  %v904_v29 = vadd.f32 1.0, %v903_v14  ;;  %v1168_v44 = vld [vmem:[%s1541_s16 + $0x8] sm:$0xff] }
 0x250   : > { %963 = vrot.lane.b32.xlu2 %v961_v40, %s1393_s23  ;;  %956 = vrot.lane.b32.xlu1 %v954_v42, %s1394_s10  ;;  %v895_v41 = vadd.f32 1.0, %v894_v15  ;;  %v988_v51 = vmul.f32 %v1768_v35, %v857_v50  ;;  %s1406_s23 = smov 60   ;;  %v1002_v56 = vmul.f32 %v1768_v35, %v875_v2  ;;  %v995_v57 = vmul.f32 %v1768_v35, %v866_v5  ;;  %v938_v42 = vld [vmem:[%s1541_s16] sm:$0xff] }
 0x251   : > { %949 = vrot.lane.b32.xlu0 %v947_v43, %s1395_s21  ;;  %s1407_s21 = smov 56   ;;  %v1009_v23 = vmul.f32 %v1768_v35, %v884_v6  ;;  %v1023_v60 = vmul.f32 %v1768_v35, %v902_v7  ;;  %v1016_v61 = vmul.f32 %v1768_v35, %v893_v8  ;;  %v1030_v62 = vmul.f32 %v1768_v35, %v911_v9 }
 0x252   : > { %v989_v55 = vadd.f32 1.0, %v988_v51  ;;  %v1003_v50 = vadd.f32 1.0, %v1002_v56  ;;  %v996_v58 = vadd.f32 1.0, %v995_v57  ;;  %v1044_v4 = vmul.f32 %v1768_v35, %v929_v10 }
 0x253   : > { %v1010_v59 = vadd.f32 1.0, %v1009_v23  ;;  %v1024_v54 = vadd.f32 1.0, %v1023_v60  ;;  %v1017_v63 = vadd.f32 1.0, %v1016_v61  ;;  %v1031_v0 = vadd.f32 1.0, %v1030_v62 }
 0x254   : > { %v1037_v2 = vmul.f32 %v1768_v35, %v920_v18  ;;  %v1045_v5 = vadd.f32 1.0, %v1044_v4  ;;  %v944_v34 = vadd.f32 1.0, %v1791_v27 }
 0x256   : > { %v1038_v6 = vadd.f32 1.0, %v1037_v2 }
 0x258   : > { %984 = vrot.lane.b32.xlu2 %v982_v45, %s1396_s12  ;;  %977 = vrot.lane.b32.xlu1 %v975_v46, %s1397_s29  ;;  %s1915_s12 = sshll.u32 %s1535_s22, 4 }
 0x259   : > { %970 = vrot.lane.b32.xlu0 %v968_v47, %s1398_s17  ;;  %s298_s29 = scalar_lea.vmem [#allocation8], %s1915_s12  ;;  %s1176_s17 = sshll.u32 %s1470_s28, 4 }
 0x25a   : > { %s1327_s12 = scalar_lea.hbm %s1906_s7, 32 }
 0x260   : > { %879 = vrot.lane.b32.xlu2 %v877_v38, %s1400_s18  ;;  %870 = vrot.lane.b32.xlu1 %v868_v39, %s1401_s19 }
 0x261   : > { %888 = vrot.lane.b32.xlu0 %v886_v48, %s1402_s15 }
 0x268   : > { %906 = vrot.lane.b32.xlu2 %v904_v29, %s1403_s20  ;;  %897 = vrot.lane.b32.xlu1 %v895_v41, %s1404_s9 }
 0x269   : > { %915 = vrot.lane.b32.xlu0 %v913_v49, %s1405_s8 }
 0x270   : > { %933 = vrot.lane.b32.xlu2 %v931_v52, %s1406_s23  ;;  %924 = vrot.lane.b32.xlu1 %v922_v53, %s1407_s21 }
 0x271   : > { %991 = vrot.lane.b32.xlu0 %v989_v55, %s1399_s11 }
 0x276   : > { %v826_v8 = vpop.permute.xlu2 %825 }
 0x278   : > { %1005 = vrot.lane.b32.xlu2 %v1003_v50, %s1400_s18  ;;  %998 = vrot.lane.b32.xlu1 %v996_v58, %s1401_s19  ;;  %s1068_s19 = scalar_lea.hbm %s1906_s7, %s1176_s17 }
 0x279   : > { %1012 = vrot.lane.b32.xlu0 %v1010_v59, %s1402_s15  ;;  %s1069_s15 = sshll.u32 %s298_s29, 4  ;;  %s1070_s15 = int_to_ptr.vmem [resolvable:$true] %s1069_s15 }
 0x27e   : > { %v853_v11 = vpop.permute.xlu2 %852 }
 0x280   : > { %1026 = vrot.lane.b32.xlu2 %v1024_v54, %s1403_s20  ;;  %1019 = vrot.lane.b32.xlu1 %v1017_v63, %s1404_s9  ;;  %s1071_s20 = sshll.u32 %s1068_s19, 4  ;;  %s1057_s9 = scalar_lea.sflag [#allocation7], %s1535_s22  ;;  %s1072_s20 = int_to_ptr.hbm [resolvable:$true] %s1071_s20 }
 0x281   : > { %1033 = vrot.lane.b32.xlu0 %v1031_v0, %s1405_s8  ;;  %s1321_s8 = sshra.s32 %s1072_s20, 4  ;;  %s1322_s8 = int_to_ptr.hbm [resolvable:$true] %s1321_s8 }
 0x282   : > { %s1323_s28 = scalar_lea.hbm %s1322_s8, 16  ;;  %p1328_p0 = scmp.lt.s32.totalorder %s1322_s8, %s1906_s7 }
 0x283   : > { %p1324_p6 = scmp.ne.s32.totalorder %s1322_s8, %s1323_s28  ;;  %p1329_p1 = scmp.lt.s32.totalorder %s1327_s12, %s1323_s28 }
 0x285   : > { %p1325_p9 = pnand %p1324_p6, %p1499_p11  ;;  %p1330_p3 = por %p1329_p1, %p1328_p0 }
 0x287   : > { %p1326_p13 = pneg %p1325_p9 }
 0x288   : > { %1047 = vrot.lane.b32.xlu2 %v1045_v5, %s1406_s23  ;;  %1040 = vrot.lane.b32.xlu1 %v1038_v6, %s1407_s21 }
 0x289   : > { %p1331_p4 = pnand %p1330_p3, %p1326_p13 }
 0x28e   : > { %v817_v7 = vpop.permute.xlu1 %816 }
 0x28f   : > { %v808_v9 = vpop.permute.xlu0 %807 }
 0x290   : > { %811 = vst.msk [vmem:[#allocation4] sm:$0xff] %vm810_vm8, %v808_v9 }
 0x291   : > { %820 = vst.msk [vmem:[#allocation4] sm:$0xff] %vm819_vm9, %v817_v7 }
 0x292   : > { %829 = vst.msk [vmem:[#allocation4] sm:$0xff] %vm828_vm10, %v826_v8 }
 0x296   : > { %v844_v3 = vpop.permute.xlu1 %843 }
 0x297   : > { %v835_v10 = vpop.permute.xlu0 %834 }
 0x298   : > { %838 = vst.msk [vmem:[#allocation4] sm:$0xff] %vm837_vm11, %v835_v10 }
 0x299   : > { %847 = vst.msk [vmem:[#allocation4] sm:$0xff] %vm846_vm12, %v844_v3 }
 0x29a   : > { %856 = vst.msk [vmem:[#allocation4] sm:$0xff] %vm855_vm13, %v853_v11 }
 0x29f   : > { %v862_v12 = vpop.permute.xlu0 %861 }
 0x2a0   : > { %865 = vst.msk [vmem:[#allocation4] sm:$0xff] %vm864_vm14, %v862_v12 }
 0x2aa   : > { %v964_v13 = vpop.permute.xlu2 %963 }
 0x2b2   : > { %v985_v14 = vpop.permute.xlu2 %984 }
 0x2ba   : > { %v880_v17 = vpop.permute.xlu2 %879 }
 0x2c2   : > { %v957_v15 = vpop.permute.xlu1 %956  ;;  %v907_v21 = vpop.permute.xlu2 %906 }
 0x2c3   : > { %v950_v16 = vpop.permute.xlu0 %949 }
 0x2ca   : > { %v978_v18 = vpop.permute.xlu1 %977  ;;  %v934_v30 = vpop.permute.xlu2 %933 }
 0x2cb   : > { %v971_v19 = vpop.permute.xlu0 %970 }
 0x2d2   : > { %v871_v20 = vpop.permute.xlu1 %870  ;;  %v1006_v33 = vpop.permute.xlu2 %1005 }
 0x2d3   : > { %874 = vst.msk [vmem:[#allocation4] sm:$0xff] %vm873_vm15, %v871_v20  ;;  %v889_v22 = vpop.permute.xlu0 %888 }
 0x2d4   : > { %883 = vst.msk [vmem:[#allocation4] sm:$0xff] %vm882_vm0, %v880_v17 }
 0x2d5   : > { %892 = vst.msk [vmem:[#allocation4] sm:$0xff] %vm891_vm2, %v889_v22 }
 0x2da   : > { %v898_v24 = vpop.permute.xlu1 %897  ;;  %v1027_v37 = vpop.permute.xlu2 %1026 }
 0x2db   : > { %901 = vst.msk [vmem:[#allocation4] sm:$0xff] %vm900_vm3, %v898_v24  ;;  %v916_v1 = vpop.permute.xlu0 %915 }
 0x2dc   : > { %910 = vst.msk [vmem:[#allocation4] sm:$0xff] %vm909_vm5, %v907_v21 }
 0x2dd   : > { %919 = vst.msk [vmem:[#allocation4] sm:$0xff] %vm918_vm6, %v916_v1 }
 0x2e2   : > { %v925_v31 = vpop.permute.xlu1 %924  ;;  %v1048_v27 = vpop.permute.xlu2 %1047 }
 0x2e3   : > { %928 = vst.msk [vmem:[#allocation4] sm:$0xff] %vm927_vm7, %v925_v31  ;;  %v992_v32 = vpop.permute.xlu0 %991 }
 0x2e4   : > { %937 = vst.msk [vmem:[#allocation4] sm:$0xff] %vm936_vm1, %v934_v30 }
 0x2ea   : > { %v999_v35 = vpop.permute.xlu1 %998 }
 0x2eb   : > { %v939_v28 = vld [vmem:[#allocation4] sm:$0xff]  ;;  %v1013_v36 = vpop.permute.xlu0 %1012 }
 0x2ec   : > { %945 = vst.msk [vmem:[#allocation4] sm:$0xff] %vm375_vm4, %v944_v34  ;;  %v940_v43 = vmul.f32 %v939_v28, %v938_v42  ;;  %vm1916_vm4 = vcmask 523264  }
 0x2ed   : > { %952 = vst.msk [vmem:[#allocation4] sm:$0xff] %vm810_vm8, %v950_v16  ;;  %vm1917_vm8 = vmmov %vm1916_vm4 }
 0x2ee   : > { %959 = vst.msk [vmem:[#allocation4] sm:$0xff] %vm819_vm9, %v957_v15 }
 0x2ef   : > { %966 = vst.msk [vmem:[#allocation4] sm:$0xff] %vm828_vm10, %v964_v13 }
 0x2f0   : > { %973 = vst.msk [vmem:[#allocation4] sm:$0xff] %vm837_vm11, %v971_v19 }
 0x2f1   : > { %980 = vst.msk [vmem:[#allocation4] sm:$0xff] %vm846_vm12, %v978_v18 }
 0x2f2   : > { %987 = vst.msk [vmem:[#allocation4] sm:$0xff] %vm855_vm13, %v985_v14  ;;  %v1020_v40 = vpop.permute.xlu1 %1019 }
 0x2f3   : > { %994 = vst.msk [vmem:[#allocation4] sm:$0xff] %vm864_vm14, %v992_v32  ;;  %v1034_v25 = vpop.permute.xlu0 %1033 }
 0x2f4   : > { %1001 = vst.msk [vmem:[#allocation4] sm:$0xff] %vm873_vm15, %v999_v35 }
 0x2f5   : > { %1008 = vst.msk [vmem:[#allocation4] sm:$0xff] %vm882_vm0, %v1006_v33 }
 0x2f6   : > { %1015 = vst.msk [vmem:[#allocation4] sm:$0xff] %vm891_vm2, %v1013_v36 }
 0x2f7   : > { %1022 = vst.msk [vmem:[#allocation4] sm:$0xff] %vm900_vm3, %v1020_v40 }
 0x2f8   : > { %1029 = vst.msk [vmem:[#allocation4] sm:$0xff] %vm909_vm5, %v1027_v37 }
 0x2f9   : > { %1036 = vst.msk [vmem:[#allocation4] sm:$0xff] %vm918_vm6, %v1034_v25 }
 0x2fa   : > { %v1041_v26 = vpop.permute.xlu1 %1040  ;;  %941 = vst.msk [vmem:[%s298_s29] sm:$0xff] %vm1916_vm4, %v940_v43 }
 0x2fb   : > { %1043 = vst.msk [vmem:[#allocation4] sm:$0xff] %vm927_vm7, %v1041_v26 }
 0x2fc   : > { %1050 = vst.msk [vmem:[#allocation4] sm:$0xff] %vm936_vm1, %v1048_v27 }
 0x303   : > { %v1052_v45 = vld [vmem:[#allocation4] sm:$0xff] }
 0x304   : > { %v1053_v46 = vmul.f32 %v1168_v44, %v1052_v45 }
 0x306   : > { %1169 = vst.msk [vmem:[%s298_s29 + $0x8] sm:$0xff] %vm1917_vm8, %v1053_v46 }
 0x307   : > { %1334 = shalt.err (!%p1331_p4)
}
 0x308   : > { %s1408_s22 = smov 128  }
 0x309   : > { %1180 = dma.vmem_to_hbm [thread:$0]  (%p1499_p11), %s1070_s15, 256, %s1072_s20, %s1057_s9, %s1408_s22, %s1408_s22, %s1394_s10  }
 0x30a PF: > { %s1086_s29 = sand.u32 1, %s1361_s24   ;;  %p1918_p7 = scmp.ge.s32.totalorder %s1373_s27, 2 }
 0x30b   : > { %s1087_s11 = scalar_lea.sflag [#allocation7], %s1086_s29 }
 0x30c   : > { %p1187_p5 = pnand %p1918_p7, %p1503_p12 }
 0x30e   : > { %p1188_p8 = pneg %p1187_p5 }
 0x310   : > { %1356 = dma.done.wait (%p1188_p8), %s1087_s11, 256  }
 0x311   : > { %1358 = vsyncadd (%p1188_p8), %s1087_s11, 4294967040  ;;  %s1919_s18 = sld [smem:[#allocation11_spill]]  ;;  %p20_p10 = scmp.ge.s32.totalorder %s1474_s30, 4  }
 0x312   : > { %s1920_s24 = smov %s1365_s25  ;;  %s1921_s25 = smov %s1369_s26 }
 0x313   : > { %s1923_s27 = smov %s1474_s30  ;;  %22 = sbr.rel (!%p20_p10) target bundleno = 5 (0x5), region = 96 }
 0x317   : > { %s1922_s26 = smov %s1919_s18 }
 0x318   :  { %1093 = vsyncpa [#allocation6], 1 }
 0x319   :  { %1095 = vsyncpa [#allocation6 + $0x1], 1 }
 0x31a   :  { %1096 = vsyncpa [#allocation7], 1 }
 0x31b   :  { %1098 = vsyncpa [#allocation7 + $0x1], 1 }

</bundles_post_ra>
